<compile_context>
chip_gen: v7x
topology: tpu7x:2x2x1
jax: 0.10.0
libtpu: 0.0.40
codegen_flags: <defaults>
</compile_context>

<pallas_src>
import jax
import jax.numpy as jnp
import numpy as np
from jax.experimental import pallas as pl
from jax.experimental.pallas import tpu as pltpu

EPS = 1e-5

# Matmul-operand dtype fed to the MXU. float32 reproduces PyTorch numerics
# tightly; set to jnp.bfloat16 on v6e/v7x for ~2x MXU throughput (~1e-3 rel
# error) -- accumulation stays f32 via preferred_element_type.
MXU_DTYPE = jnp.float32


# --------------------------------------------------------------------------- #
# In-kernel helpers
# --------------------------------------------------------------------------- #
def _im2col_matmul(get_tap, w_ref, patch_ref):
    """Assemble (H*W, 9*C) im2col patches into VMEM scratch and do ONE matmul."""
    hw, nine_c = patch_ref.shape
    c = nine_c // 9
    for ky in range(3):
        for kx in range(3):
            t = ky * 3 + kx
            patch_ref[:, t * c:(t + 1) * c] = get_tap(ky, kx).astype(patch_ref.dtype)
    # Single MXU push per conv, K = 9*C, f32 accumulation.
    return jnp.dot(patch_ref[...], w_ref[...], preferred_element_type=jnp.float32)


def _write_channel_stats(stats_ref, acc):
    """Per-channel sum and sum-of-squares in one traversal (fused BN stats)."""
    stats_ref[0, 0:1, :] = jnp.sum(acc, axis=0, keepdims=True)
    stats_ref[0, 1:2, :] = jnp.sum(acc * acc, axis=0, keepdims=True)


# --------------------------------------------------------------------------- #
# Pass 1: conv1 (3x3, stride 1, pad 1) + partial BN1 stats     grid = (N,)
# --------------------------------------------------------------------------- #
def conv_stats_kernel(xp_ref, w_ref, raw_ref, stats_ref, patch_ref):
    # xp_ref   : (1, H+2, W+2, Cin)   spatially pre-padded input sample
    # w_ref    : (9*Cin, Cout)        im2col weight slab
    # raw_ref  : (1, H*W, Cout)       raw (pre-BN) conv output
    # stats_ref: (1, 2, Cout)         per-sample channel sum / sumsq
    # patch_ref: (H*W, 9*Cin)         VMEM scratch for the im2col slab
    _, hp, wp, cin = xp_ref.shape
    H, W = hp - 2, wp - 2

    def get_tap(ky, kx):
        return xp_ref[0, ky:ky + H, kx:kx + W, :].reshape(H * W, cin)

    acc = _im2col_matmul(get_tap, w_ref, patch_ref)          # (H*W, Cout) f32
    raw_ref[...] = acc.reshape(raw_ref.shape)
    _write_channel_stats(stats_ref, acc)


# --------------------------------------------------------------------------- #
# Pass 2: bn1 (folded) + relu -> conv2 + partial BN2 stats     grid = (N,)
# --------------------------------------------------------------------------- #
def bn_relu_conv_stats_kernel(raw1_ref, scale_ref, shift_ref, w_ref,
                              raw2_ref, stats_ref, ypad_ref, patch_ref):
    # raw1_ref : (1, H*W, C)   raw conv1 output
    # scale/shift_ref: (1, C)  folded BN1 params (gamma*rsqrt(var+eps), beta-...)
    # w_ref    : (9*C, C)      conv2 weight slab
    # raw2_ref : (1, H*W, C)   raw conv2 output
    # stats_ref: (1, 2, C)
    # ypad_ref : (H+2, W+2, C) per-sample padded activation scratch
    # patch_ref: (H*W, 9*C)
    hp, wp, c = ypad_ref.shape
    H, W = hp - 2, wp - 2

    # bn1 folded into a single FMA, fused with ReLU.
    y1 = jnp.maximum(raw1_ref[0] * scale_ref[...] + shift_ref[...], 0.0)

    # Zero ONLY the 1-wide halo, then write the interior (no full zero-fill,
    # no full-buffer reload into a value).
    ypad_ref[0:1, :, :] = jnp.zeros((1, wp, c), jnp.float32)
    ypad_ref[hp - 1:hp, :, :] = jnp.zeros((1, wp, c), jnp.float32)
    ypad_ref[:, 0:1, :] = jnp.zeros((hp, 1, c), jnp.float32)
    ypad_ref[:, wp - 1:wp, :] = jnp.zeros((hp, 1, c), jnp.float32)
    ypad_ref[1:H + 1, 1:W + 1, :] = y1.reshape(H, W, c)

    def get_tap(ky, kx):
        return ypad_ref[ky:ky + H, kx:kx + W, :].reshape(H * W, c)

    acc = _im2col_matmul(get_tap, w_ref, patch_ref)          # (H*W, C) f32
    raw2_ref[...] = acc.reshape(raw2_ref.shape)
    _write_channel_stats(stats_ref, acc)


# --------------------------------------------------------------------------- #
# Pass 3: bn2 (folded) + residual add + relu, fully lane-dense  grid = (N,)
# --------------------------------------------------------------------------- #
def bn_add_relu_kernel(raw2_ref, res_ref, scale_ref, shift_ref, out_ref):
    # All operands are (1, H, W*C) / (1, W*C): last dim is a multiple of the
    # lane width for the test shape (W*C = 128) -> unmasked full-lane stores.
    out_ref[...] = jnp.maximum(
        raw2_ref[...] * scale_ref[...] + shift_ref[...] + res_ref[...], 0.0)


# --------------------------------------------------------------------------- #
# Wrapper
# --------------------------------------------------------------------------- #
def _fold_bn(stats, gamma, beta, count):
    """Combine per-sample (sum, sumsq) -> per-channel (scale, shift), f32."""
    s = jnp.sum(stats[:, 0, :], axis=0)
    ss = jnp.sum(stats[:, 1, :], axis=0)
    mean = s / count
    var = ss / count - mean * mean                     # biased (training) var
    scale = gamma * jax.lax.rsqrt(var + EPS)
    shift = beta - mean * scale
    return (scale.reshape(1, -1).astype(jnp.float32),
            shift.reshape(1, -1).astype(jnp.float32))


def residual_block(x_nchw, w1_oihw, w2_oihw, g1, b1, g2, b2):
    """x_nchw: (N, C, H, W) f32. Returns (N, C, H, W) f32."""
    N, Cin, H, W = x_nchw.shape
    Cout = w1_oihw.shape[0]
    assert Cin == Cout, "identity residual requires in_channels == out_channels"

    f32 = jnp.float32
    x_nhwc = jnp.transpose(x_nchw, (0, 2, 3, 1)).astype(f32)
    xp = jnp.pad(x_nhwc, ((0, 0), (1, 1), (1, 1), (0, 0)))

    # PyTorch OIHW -> (ky, kx, ci, co) -> (9*C, Cout) slab matching the im2col
    # patch column order (t*C + ci, t = ky*3 + kx).
    w1s = jnp.transpose(w1_oihw, (2, 3, 1, 0)).reshape(9 * Cin, Cout).astype(MXU_DTYPE)
    w2s = jnp.transpose(w2_oihw, (2, 3, 1, 0)).reshape(9 * Cout, Cout).astype(MXU_DTYPE)

    count = N * H * W
    cparams = pltpu.CompilerParams(dimension_semantics=("parallel",))

    # ---- pass 1: conv1 + stats ----
    raw1, st1 = pl.pallas_call(
        conv_stats_kernel,
        grid=(N,),
        in_specs=[pl.BlockSpec((1, H + 2, W + 2, Cin), lambda n: (n, 0, 0, 0)),
                  pl.BlockSpec((9 * Cin, Cout), lambda n: (0, 0))],
        out_specs=[pl.BlockSpec((1, H * W, Cout), lambda n: (n, 0, 0)),
                   pl.BlockSpec((1, 2, Cout), lambda n: (n, 0, 0))],
        out_shape=(jax.ShapeDtypeStruct((N, H * W, Cout), f32),
                   jax.ShapeDtypeStruct((N, 2, Cout), f32)),
        scratch_shapes=[pltpu.VMEM((H * W, 9 * Cin), MXU_DTYPE)],
        compiler_params=cparams,
    )(xp, w1s)

    scale1, shift1 = _fold_bn(st1, g1, b1, count)

    # ---- pass 2: bn1 + relu -> conv2 + stats ----
    raw2, st2 = pl.pallas_call(
        bn_relu_conv_stats_kernel,
        grid=(N,),
        in_specs=[pl.BlockSpec((1, H * W, Cout), lambda n: (n, 0, 0)),
                  pl.BlockSpec((1, Cout), lambda n: (0, 0)),
                  pl.BlockSpec((1, Cout), lambda n: (0, 0)),
                  pl.BlockSpec((9 * Cout, Cout), lambda n: (0, 0))],
        out_specs=[pl.BlockSpec((1, H * W, Cout), lambda n: (n, 0, 0)),
                   pl.BlockSpec((1, 2, Cout), lambda n: (n, 0, 0))],
        out_shape=(jax.ShapeDtypeStruct((N, H * W, Cout), f32),
                   jax.ShapeDtypeStruct((N, 2, Cout), f32)),
        scratch_shapes=[pltpu.VMEM((H + 2, W + 2, Cout), f32),
                        pltpu.VMEM((H * W, 9 * Cout), MXU_DTYPE)],
        compiler_params=cparams,
    )(raw1, scale1, shift1, w2s)

    scale2, shift2 = _fold_bn(st2, g2, b2, count)

    # ---- pass 3: bn2 + residual + relu (lane-dense: last dim = W*C) ----
    raw2_d = raw2.reshape(N, H, W * Cout)          # free row-major reshape
    res_d = x_nhwc.reshape(N, H, W * Cout)         # residual = original x
    scale2_d = jnp.tile(scale2, (1, W))            # index w*C + c -> scale2[c]
    shift2_d = jnp.tile(shift2, (1, W))

    out_d = pl.pallas_call(
        bn_add_relu_kernel,
        grid=(N,),
        in_specs=[pl.BlockSpec((1, H, W * Cout), lambda n: (n, 0, 0)),
                  pl.BlockSpec((1, H, W * Cout), lambda n: (n, 0, 0)),
                  pl.BlockSpec((1, W * Cout), lambda n: (0, 0)),
                  pl.BlockSpec((1, W * Cout), lambda n: (0, 0))],
        out_specs=pl.BlockSpec((1, H, W * Cout), lambda n: (n, 0, 0)),
        out_shape=jax.ShapeDtypeStruct((N, H, W * Cout), f32),
        compiler_params=cparams,
    )(raw2_d, res_d, scale2_d, shift2_d)

    out_nhwc = out_d.reshape(N, H, W, Cout)
    return jnp.transpose(out_nhwc, (0, 3, 1, 2))


# --------------------------------------------------------------------------- #
# Plain-JAX reference (NCHW), mirrors PyTorch semantics
# --------------------------------------------------------------------------- #
def residual_block_ref(x, w1, w2, g1, b1, g2, b2):
    def conv(a, w):
        return jax.lax.conv_general_dilated(
            a, w, window_strides=(1, 1), padding=((1, 1), (1, 1)),
            dimension_numbers=("NCHW", "OIHW", "NCHW"))

    def bn(y, g, b):
        mean = jnp.mean(y, axis=(0, 2, 3), keepdims=True)
        var = jnp.mean((y - mean) ** 2, axis=(0, 2, 3), keepdims=True)
        return ((y - mean) * jax.lax.rsqrt(var + EPS)
                * g.reshape(1, -1, 1, 1) + b.reshape(1, -1, 1, 1))

    out = jax.nn.relu(bn(conv(x, w1), g1, b1))
    out = bn(conv(out, w2), g2, b2)
    return jax.nn.relu(out + x)


if __name__ == "__main__":
    N, C, H, W = 2, 8, 16, 16   # in_channels == out_channels, stride=1, no downsample

    key = jax.random.PRNGKey(0)
    kx, kw1, kw2 = jax.random.split(key, 3)
    x = jax.random.normal(kx, (N, C, H, W), jnp.float32)
    w1 = jax.random.normal(kw1, (C, C, 3, 3), jnp.float32) * 0.1
    w2 = jax.random.normal(kw2, (C, C, 3, 3), jnp.float32) * 0.1
    g1 = jnp.ones((C,), jnp.float32)
    b1 = jnp.zeros((C,), jnp.float32)
    g2 = jnp.ones((C,), jnp.float32)
    b2 = jnp.zeros((C,), jnp.float32)

    out = jax.block_until_ready(residual_block(x, w1, w2, g1, b1, g2, b2))
    ref = jax.block_until_ready(residual_block_ref(x, w1, w2, g1, b1, g2, b2))

    np.testing.assert_allclose(np.asarray(out), np.asarray(ref),
                               rtol=2e-4, atol=2e-4)
    print("KERNEL_OK")
</pallas_src>

<mosaic_0001>
module attributes {stable_mosaic.version = 11 : i64} {
  func.func @conv_stats_kernel(%arg0: i32, %arg1: memref<1x18x18x8xf32, #tpu.memory_space<vmem>>, %arg2: memref<72x8xf32, #tpu.memory_space<vmem>>, %arg3: memref<1x256x8xf32, #tpu.memory_space<vmem>>, %arg4: memref<1x2x8xf32, #tpu.memory_space<vmem>>, %arg5: memref<256x72xf32, #tpu.memory_space<vmem>>) attributes {dimension_semantics = [#tpu.dimension_semantics<parallel>], iteration_bounds = array<i64: 2>, scalar_prefetch = 0 : i64, scratch_operands = 1 : i64, tpu.core_type = #tpu.core_type<tc>, window_params = [{transform_indices = @transform_0, window_bounds = array<i64: 1, 18, 18, 8>}, {pipeline_mode = #tpu.pipeline_mode<synchronous>, transform_indices = @transform_1, window_bounds = array<i64: 72, 8>}, {transform_indices = @transform_2, window_bounds = array<i64: 1, 256, 8>}, {transform_indices = @transform_3, window_bounds = array<i64: 1, 2, 8>}]} {
    %c0 = arith.constant 0 : index
    %c0_0 = arith.constant 0 : index
    %c0_1 = arith.constant 0 : index
    %c0_2 = arith.constant 0 : index
    %0 = vector.load %arg1[%c0, %c0_0, %c0_1, %c0_2] : memref<1x18x18x8xf32, #tpu.memory_space<vmem>>, vector<1x16x16x8xf32>
    %1 = vector.shape_cast %0 : vector<1x16x16x8xf32> to vector<16x16x8xf32>
    %2 = vector.shape_cast %1 : vector<16x16x8xf32> to vector<256x8xf32>
    %c0_3 = arith.constant 0 : index
    %c0_4 = arith.constant 0 : index
    %3 = vector.load %arg5[%c0_3, %c0_4] : memref<256x72xf32, #tpu.memory_space<vmem>>, vector<256x8xf32>
    tpu.vector_store %arg5[%c0_3, %c0_4], %2 {strides = array<i32>} : memref<256x72xf32, #tpu.memory_space<vmem>>, vector<256x8xf32>,
    %c0_5 = arith.constant 0 : index
    %c0_6 = arith.constant 0 : index
    %c1 = arith.constant 1 : index
    %c0_7 = arith.constant 0 : index
    %4 = vector.load %arg1[%c0_5, %c0_6, %c1, %c0_7] : memref<1x18x18x8xf32, #tpu.memory_space<vmem>>, vector<1x16x16x8xf32>
    %5 = vector.shape_cast %4 : vector<1x16x16x8xf32> to vector<16x16x8xf32>
    %6 = vector.shape_cast %5 : vector<16x16x8xf32> to vector<256x8xf32>
    %c0_8 = arith.constant 0 : index
    %c8 = arith.constant 8 : index
    %7 = vector.load %arg5[%c0_8, %c8] : memref<256x72xf32, #tpu.memory_space<vmem>>, vector<256x8xf32>
    tpu.vector_store %arg5[%c0_8, %c8], %6 {strides = array<i32>} : memref<256x72xf32, #tpu.memory_space<vmem>>, vector<256x8xf32>,
    %c0_9 = arith.constant 0 : index
    %c0_10 = arith.constant 0 : index
    %c2 = arith.constant 2 : index
    %c0_11 = arith.constant 0 : index
    %8 = vector.load %arg1[%c0_9, %c0_10, %c2, %c0_11] : memref<1x18x18x8xf32, #tpu.memory_space<vmem>>, vector<1x16x16x8xf32>
    %9 = vector.shape_cast %8 : vector<1x16x16x8xf32> to vector<16x16x8xf32>
    %10 = vector.shape_cast %9 : vector<16x16x8xf32> to vector<256x8xf32>
    %c0_12 = arith.constant 0 : index
    %c16 = arith.constant 16 : index
    %11 = vector.load %arg5[%c0_12, %c16] : memref<256x72xf32, #tpu.memory_space<vmem>>, vector<256x8xf32>
    tpu.vector_store %arg5[%c0_12, %c16], %10 {strides = array<i32>} : memref<256x72xf32, #tpu.memory_space<vmem>>, vector<256x8xf32>,
    %c0_13 = arith.constant 0 : index
    %c1_14 = arith.constant 1 : index
    %c0_15 = arith.constant 0 : index
    %c0_16 = arith.constant 0 : index
    %12 = vector.load %arg1[%c0_13, %c1_14, %c0_15, %c0_16] : memref<1x18x18x8xf32, #tpu.memory_space<vmem>>, vector<1x16x16x8xf32>
    %13 = vector.shape_cast %12 : vector<1x16x16x8xf32> to vector<16x16x8xf32>
    %14 = vector.shape_cast %13 : vector<16x16x8xf32> to vector<256x8xf32>
    %c0_17 = arith.constant 0 : index
    %c24 = arith.constant 24 : index
    %15 = vector.load %arg5[%c0_17, %c24] : memref<256x72xf32, #tpu.memory_space<vmem>>, vector<256x8xf32>
    tpu.vector_store %arg5[%c0_17, %c24], %14 {strides = array<i32>} : memref<256x72xf32, #tpu.memory_space<vmem>>, vector<256x8xf32>,
    %c0_18 = arith.constant 0 : index
    %c1_19 = arith.constant 1 : index
    %c1_20 = arith.constant 1 : index
    %c0_21 = arith.constant 0 : index
    %16 = vector.load %arg1[%c0_18, %c1_19, %c1_20, %c0_21] : memref<1x18x18x8xf32, #tpu.memory_space<vmem>>, vector<1x16x16x8xf32>
    %17 = vector.shape_cast %16 : vector<1x16x16x8xf32> to vector<16x16x8xf32>
    %18 = vector.shape_cast %17 : vector<16x16x8xf32> to vector<256x8xf32>
    %c0_22 = arith.constant 0 : index
    %c32 = arith.constant 32 : index
    %19 = vector.load %arg5[%c0_22, %c32] : memref<256x72xf32, #tpu.memory_space<vmem>>, vector<256x8xf32>
    tpu.vector_store %arg5[%c0_22, %c32], %18 {strides = array<i32>} : memref<256x72xf32, #tpu.memory_space<vmem>>, vector<256x8xf32>,
    %c0_23 = arith.constant 0 : index
    %c1_24 = arith.constant 1 : index
    %c2_25 = arith.constant 2 : index
    %c0_26 = arith.constant 0 : index
    %20 = vector.load %arg1[%c0_23, %c1_24, %c2_25, %c0_26] : memref<1x18x18x8xf32, #tpu.memory_space<vmem>>, vector<1x16x16x8xf32>
    %21 = vector.shape_cast %20 : vector<1x16x16x8xf32> to vector<16x16x8xf32>
    %22 = vector.shape_cast %21 : vector<16x16x8xf32> to vector<256x8xf32>
    %c0_27 = arith.constant 0 : index
    %c40 = arith.constant 40 : index
    %23 = vector.load %arg5[%c0_27, %c40] : memref<256x72xf32, #tpu.memory_space<vmem>>, vector<256x8xf32>
    tpu.vector_store %arg5[%c0_27, %c40], %22 {strides = array<i32>} : memref<256x72xf32, #tpu.memory_space<vmem>>, vector<256x8xf32>,
    %c0_28 = arith.constant 0 : index
    %c2_29 = arith.constant 2 : index
    %c0_30 = arith.constant 0 : index
    %c0_31 = arith.constant 0 : index
    %24 = vector.load %arg1[%c0_28, %c2_29, %c0_30, %c0_31] : memref<1x18x18x8xf32, #tpu.memory_space<vmem>>, vector<1x16x16x8xf32>
    %25 = vector.shape_cast %24 : vector<1x16x16x8xf32> to vector<16x16x8xf32>
    %26 = vector.shape_cast %25 : vector<16x16x8xf32> to vector<256x8xf32>
    %c0_32 = arith.constant 0 : index
    %c48 = arith.constant 48 : index
    %27 = vector.load %arg5[%c0_32, %c48] : memref<256x72xf32, #tpu.memory_space<vmem>>, vector<256x8xf32>
    tpu.vector_store %arg5[%c0_32, %c48], %26 {strides = array<i32>} : memref<256x72xf32, #tpu.memory_space<vmem>>, vector<256x8xf32>,
    %c0_33 = arith.constant 0 : index
    %c2_34 = arith.constant 2 : index
    %c1_35 = arith.constant 1 : index
    %c0_36 = arith.constant 0 : index
    %28 = vector.load %arg1[%c0_33, %c2_34, %c1_35, %c0_36] : memref<1x18x18x8xf32, #tpu.memory_space<vmem>>, vector<1x16x16x8xf32>
    %29 = vector.shape_cast %28 : vector<1x16x16x8xf32> to vector<16x16x8xf32>
    %30 = vector.shape_cast %29 : vector<16x16x8xf32> to vector<256x8xf32>
    %c0_37 = arith.constant 0 : index
    %c56 = arith.constant 56 : index
    %31 = vector.load %arg5[%c0_37, %c56] : memref<256x72xf32, #tpu.memory_space<vmem>>, vector<256x8xf32>
    tpu.vector_store %arg5[%c0_37, %c56], %30 {strides = array<i32>} : memref<256x72xf32, #tpu.memory_space<vmem>>, vector<256x8xf32>,
    %c0_38 = arith.constant 0 : index
    %c2_39 = arith.constant 2 : index
    %c2_40 = arith.constant 2 : index
    %c0_41 = arith.constant 0 : index
    %32 = vector.load %arg1[%c0_38, %c2_39, %c2_40, %c0_41] : memref<1x18x18x8xf32, #tpu.memory_space<vmem>>, vector<1x16x16x8xf32>
    %33 = vector.shape_cast %32 : vector<1x16x16x8xf32> to vector<16x16x8xf32>
    %34 = vector.shape_cast %33 : vector<16x16x8xf32> to vector<256x8xf32>
    %c0_42 = arith.constant 0 : index
    %c64 = arith.constant 64 : index
    %35 = vector.load %arg5[%c0_42, %c64] : memref<256x72xf32, #tpu.memory_space<vmem>>, vector<256x8xf32>
    tpu.vector_store %arg5[%c0_42, %c64], %34 {strides = array<i32>} : memref<256x72xf32, #tpu.memory_space<vmem>>, vector<256x8xf32>,
    %c0_43 = arith.constant 0 : index
    %c0_44 = arith.constant 0 : index
    %36 = vector.load %arg5[%c0_43, %c0_44] : memref<256x72xf32, #tpu.memory_space<vmem>>, vector<256x72xf32>
    %c0_45 = arith.constant 0 : index
    %c0_46 = arith.constant 0 : index
    %37 = vector.load %arg2[%c0_45, %c0_46] : memref<72x8xf32, #tpu.memory_space<vmem>>, vector<72x8xf32>
    %cst = arith.constant dense<0.000000e+00> : vector<256x8xf32>
    %38 = tpu.matmul %36, %37, %cst {dimension_numbers = #tpu.dot_dimension_numbers<[1], [0], [0], [1], [0, 0, 1, 1], [], []>} : vector<256x72xf32>, vector<72x8xf32>, vector<256x8xf32> -> vector<256x8xf32>
    %39 = vector.shape_cast %38 : vector<256x8xf32> to vector<1x256x8xf32>
    %c0_47 = arith.constant 0 : index
    %c0_48 = arith.constant 0 : index
    %c0_49 = arith.constant 0 : index
    %40 = vector.load %arg3[%c0_47, %c0_48, %c0_49] : memref<1x256x8xf32, #tpu.memory_space<vmem>>, vector<1x256x8xf32>
    tpu.vector_store %arg3[%c0_47, %c0_48, %c0_49], %39 {strides = array<i32>} : memref<1x256x8xf32, #tpu.memory_space<vmem>>, vector<1x256x8xf32>,
    %cst_50 = arith.constant dense<0.000000e+00> : vector<8xf32>
    %41 = vector.multi_reduction <add>, %38, %cst_50 [0] : vector<256x8xf32> to vector<8xf32>
    %42 = vector.shape_cast %41 : vector<8xf32> to vector<1x8xf32>
    %c0_51 = arith.constant 0 : index
    %c0_52 = arith.constant 0 : index
    %c0_53 = arith.constant 0 : index
    %43 = vector.load %arg4[%c0_51, %c0_52, %c0_53] : memref<1x2x8xf32, #tpu.memory_space<vmem>>, vector<1x1x8xf32>
    %44 = vector.shape_cast %43 : vector<1x1x8xf32> to vector<1x8xf32>
    %45 = vector.shape_cast %42 : vector<1x8xf32> to vector<1x1x8xf32>
    tpu.vector_store %arg4[%c0_51, %c0_52, %c0_53], %45 {strides = array<i32>} : memref<1x2x8xf32, #tpu.memory_space<vmem>>, vector<1x1x8xf32>,
    %46 = arith.mulf %38, %38 : vector<256x8xf32>
    %cst_54 = arith.constant dense<0.000000e+00> : vector<8xf32>
    %47 = vector.multi_reduction <add>, %46, %cst_54 [0] : vector<256x8xf32> to vector<8xf32>
    %48 = vector.shape_cast %47 : vector<8xf32> to vector<1x8xf32>
    %c0_55 = arith.constant 0 : index
    %c1_56 = arith.constant 1 : index
    %c0_57 = arith.constant 0 : index
    %49 = vector.load %arg4[%c0_55, %c1_56, %c0_57] : memref<1x2x8xf32, #tpu.memory_space<vmem>>, vector<1x1x8xf32>
    %50 = vector.shape_cast %49 : vector<1x1x8xf32> to vector<1x8xf32>
    %51 = vector.shape_cast %48 : vector<1x8xf32> to vector<1x1x8xf32>
    tpu.vector_store %arg4[%c0_55, %c1_56, %c0_57], %51 {strides = array<i32>} : memref<1x2x8xf32, #tpu.memory_space<vmem>>, vector<1x1x8xf32>,
    return
  }
  func.func @transform_0(%arg0: i32) -> (i32, i32, i32, i32) {
    %c0_i32 = arith.constant 0 : i32
    %c0_i32_0 = arith.constant 0 : i32
    %c0_i32_1 = arith.constant 0 : i32
    %c0_i32_2 = arith.constant 0 : i32
    return %arg0, %c0_i32, %c0_i32_0, %c0_i32_1 : i32, i32, i32, i32
  }
  func.func @transform_1(%arg0: i32) -> (i32, i32) {
    %c0_i32 = arith.constant 0 : i32
    %c0_i32_0 = arith.constant 0 : i32
    %c0_i32_1 = arith.constant 0 : i32
    return %c0_i32, %c0_i32_0 : i32, i32
  }
  func.func @transform_2(%arg0: i32) -> (i32, i32, i32) {
    %c0_i32 = arith.constant 0 : i32
    %c0_i32_0 = arith.constant 0 : i32
    %c0_i32_1 = arith.constant 0 : i32
    return %arg0, %c0_i32, %c0_i32_0 : i32, i32, i32
  }
  func.func @transform_3(%arg0: i32) -> (i32, i32, i32) {
    %c0_i32 = arith.constant 0 : i32
    %c0_i32_0 = arith.constant 0 : i32
    %c0_i32_1 = arith.constant 0 : i32
    return %arg0, %c0_i32, %c0_i32_0 : i32, i32, i32
  }
}

</mosaic_0001>

<bundles_post_ra>
// kernel: tpu_custom_call.1
= control target key start
LH: loop header
LB: loop body
LE: loop exit
PB: predicated region body
PF: predicated region fallthrough
CT: control target
= control target key end

     0   :  { %9 = vsyncpa [#allocation4], 0  ;;  %s4228_s0 = inlined_call_operand.vmem [shape: f32[2,18,18,8], index: 0, kind: input, shape index: {}]   ;;  %s4229_s1 = inlined_call_operand.vmem [shape: f32[72,8], index: 1, kind: input, shape index: {}]   ;;  %s4230_s2 = inlined_call_operand.vmem [shape: f32[2,256,8], index: 2, kind: output, shape index: {0}]   ;;  %s4231_s3 = inlined_call_operand.hbm [shape: f32[2,2,8], index: 3, kind: output, shape index: {1}]  }
   0x1   :  { %11 = vsyncpa [#allocation4 + $0x1], 0  ;;  %s2978_s12 = smov 0   ;;  %s2980_s13 = smov 0  }
   0x2   :  { %s2982_s14 = smov 0   ;;  %s2984_s15 = smov 0  }
   0x3 LB: > { %s2999_s16 = sadd.s32 4294967295, %s2947_s15   ;;  %s2467_s17 = sadd.s32 4294967294, %s2947_s15   ;;  %s2947_s15 = sphi %s2984_s15, %s4237_s15   ;;  %s2943_s14 = sphi %s2982_s14, %s4236_s14   ;;  %s2939_s13 = sphi %s2980_s13, %s4235_s13   ;;  %s2935_s12 = sphi %s2978_s12, %s4234_s12  }
   0x4   : > { %s3003_s18 = sadd.s32 1, %s2947_s15   ;;  %s97_s19 = sadd.s32 1, %s2943_s14 }
   0x5   : > { %s94_s20 = ssub.s32 %s2947_s15, %s3003_s18  ;;  %p107_p0 = scmp.ne.s32.totalorder %s2943_s14, %s2939_s13 }
   0x6   : > { %p95_p1 = scmp.eq.s32.totalorder %s94_s20, 0  ;;  %p108_p2 = scmp.eq.s32.totalorder %s2999_s16, 1 }
   0x7   : > { %p113_p3 = scmp.ne.s32.totalorder %s2939_s13, %s2935_s12  ;;  %p114_p4 = scmp.eq.s32.totalorder %s2467_s17, 1 }
   0x8   : > { %s3014_s21 = scalar_select %p95_p1, %s2943_s14, %s97_s19  }
   0x9   : > { %p3016_p5 = por %p108_p2, %p107_p0  ;;  %p3020_p6 = por %p114_p4, %p113_p3 }
   0xa   : > { %p2470_p7 = scmp.ge.s32.totalorder %s2947_s15, 1  ;;  %p143_p8 = scmp.lt.s32.totalorder %s2947_s15, 3 }
   0xc   : > { %p144_p9 = pnand %p2470_p7, %p143_p8 }
   0xd   : > { %p172_p10 = scmp.lt.s32.totalorder (!%p144_p9), %s2999_s16, 1  ;;  %s2949_s29 = smov (!%p144_p9), 8   ;;  %vm214_vm0 = vcmask (!%p144_p9), 64512   ;;  %vm407_vm1 = vcmask (!%p144_p9), 130112   ;;  %vm600_vm2 = vcmask (!%p144_p9), 195712   ;;  %vm794_vm3 = vcmask (!%p144_p9), 261312  }
   0xe   : > { %147 = sbr.rel (%p144_p9) target bundleno = 905 (0x389), region = 28  ;;  %s2950_s30 = smov (!%p144_p9), 16   ;;  %vm987_vm4 = vcmask (!%p144_p9), 326912   ;;  %vm1180_vm5 = vcmask (!%p144_p9), 392512   ;;  %vm1374_vm6 = vcmask (!%p144_p9), 458112   ;;  %vm1567_vm7 = vcmask (!%p144_p9), 523712  }
   0xf   : > { %s2951_s4 = smov (!%p144_p9), 24   ;;  %s2952_s9 = smov (!%p144_p9), 32   ;;  %vm1760_vm8 = vcmask (!%p144_p9), 589312   ;;  %vm1834_vm9 = vcmask (!%p144_p9), 588800   ;;  %vm2257_vm10 = vcmask (!%p144_p9), 57344  }
  0x10   : > { %s2953_s20 = smov (!%p144_p9), 40   ;;  %s2955_s10 = smov (!%p144_p9), 56  }
  0x11   : > { %s2956_s11 = smov (!%p144_p9), 64   ;;  %s2700_s26 = sshll.u32 (!%p144_p9), %s2999_s16, 5 }
  0x12   : > { %s4186_s6 = scalar_lea.hbm (!%p144_p9), %s4231_s3, %s2700_s26 }
  0x15   : > { %s3028_s24 = scalar_select %p172_p10, %s2999_s16, 1 }
  0x16   : > { %s2957_s16 = smov [#allocation3]  }
  0x17   : > { %s2837_s25 = smul.u32 432, %s3028_s24 }
  0x19   : > { %s3034_s28 = scalar_lea.vmem %s4228_s0, %s2837_s25 }
  0x1a   : > { %v247_v0 = vld [vmem:[%s3034_s28 + $0x1] sm:$0xff]  ;;  %v3038_v1 = vld [vmem:[%s3034_s28 + $0x19] sm:$0xff]  ;;  %v248_v2 = vld [vmem:[%s3034_s28 + $0x9] sm:$0xff] }
  0x1b   : > { %311 = vrot.lane.b32.xlu0 %v247_v0, %s2949_s29  ;;  %315 = vrot.lane.b32.xlu1 %v3038_v1, %s2949_s29  ;;  %v3045_v3 = vld [vmem:[%s3034_s28 + $0x21] sm:$0xff]  ;;  %v3051_v4 = vld [vmem:[%s3034_s28 + $0x31] sm:$0xff] }
  0x1c   : > { %v3054_v5 = vld [vmem:[%s3034_s28 + $0x39] sm:$0xff]  ;;  %v3061_v6 = vld [vmem:[%s3034_s28 + $0x49] sm:$0xff]  ;;  %v3064_v7 = vld [vmem:[%s3034_s28 + $0x51] sm:$0xff] }
  0x1d   : > { %v3071_v8 = vld [vmem:[%s3034_s28 + $0x61] sm:$0xff]  ;;  %v3074_v9 = vld [vmem:[%s3034_s28 + $0x69] sm:$0xff]  ;;  %v3081_v10 = vld [vmem:[%s3034_s28 + $0x79] sm:$0xff] }
  0x1e   : > { %v3084_v11 = vld [vmem:[%s3034_s28 + $0x81] sm:$0xff]  ;;  %v3092_v13 = vld [vmem:[%s3034_s28 + $0x18] sm:$0xff]  ;;  %v3109_v18 = vld [vmem:[%s3034_s28 + $0xa9] sm:$0xff] }
  0x1f   : > { %313 = vrot.lane.b32.xlu0 %v248_v2, %s2949_s29  ;;  %317 = vrot.lane.b32.xlu1 %v3045_v3, %s2949_s29  ;;  %v182_v12 = vld [vmem:[%s3034_s28] sm:$0xff]  ;;  %v3095_v14 = vld [vmem:[%s3034_s28 + $0x91] sm:$0xff]  ;;  %217 = vst.msk [vmem:[#allocation2 + $0x10] sm:$0xff] %vm214_vm0, %v3092_v13 }
  0x20   : > { %v3098_v15 = vld [vmem:[%s3034_s28 + $0x99] sm:$0xff]  ;;  %215 = vst.msk [vmem:[#allocation2] sm:$0xff] %vm214_vm0, %v182_v12  ;;  %v183_v16 = vld [vmem:[%s3034_s28 + $0x8] sm:$0xff]  ;;  %v3114_v19 = vld [vmem:[%s3034_s28 + $0x30] sm:$0xff] }
  0x21   : > { %216 = vst.msk [vmem:[#allocation2 + $0x8] sm:$0xff] %vm214_vm0, %v183_v16  ;;  %v3106_v17 = vld [vmem:[%s3034_s28 + $0x20] sm:$0xff]  ;;  %v3117_v20 = vld [vmem:[%s3034_s28 + $0x38] sm:$0xff]  ;;  %219 = vst.msk [vmem:[#allocation2 + $0x20] sm:$0xff] %vm214_vm0, %v3114_v19 }
  0x22   : > { %218 = vst.msk [vmem:[#allocation2 + $0x18] sm:$0xff] %vm214_vm0, %v3106_v17  ;;  %v3124_v21 = vld [vmem:[%s3034_s28 + $0xb1] sm:$0xff]  ;;  %220 = vst.msk [vmem:[#allocation2 + $0x28] sm:$0xff] %vm214_vm0, %v3117_v20  ;;  %v3131_v22 = vld [vmem:[%s3034_s28 + $0x48] sm:$0xff] }
  0x23   : > { %319 = vrot.lane.b32.xlu0 %v3051_v4, %s2949_s29  ;;  %321 = vrot.lane.b32.xlu1 %v3054_v5, %s2949_s29  ;;  %221 = vst.msk [vmem:[#allocation2 + $0x30] sm:$0xff] %vm214_vm0, %v3131_v22  ;;  %v3136_v23 = vld [vmem:[%s3034_s28 + $0x50] sm:$0xff]  ;;  %v3139_v24 = vld [vmem:[%s3034_s28 + $0x60] sm:$0xff] }
  0x24   : > { %v3142_v25 = vld [vmem:[%s3034_s28 + $0x68] sm:$0xff]  ;;  %222 = vst.msk [vmem:[#allocation2 + $0x38] sm:$0xff] %vm214_vm0, %v3136_v23  ;;  %223 = vst.msk [vmem:[#allocation2 + $0x40] sm:$0xff] %vm214_vm0, %v3139_v24  ;;  %v3151_v26 = vld [vmem:[%s3034_s28 + $0x78] sm:$0xff] }
  0x25   : > { %224 = vst.msk [vmem:[#allocation2 + $0x48] sm:$0xff] %vm214_vm0, %v3142_v25  ;;  %v3154_v27 = vld [vmem:[%s3034_s28 + $0x80] sm:$0xff]  ;;  %v3157_v28 = vld [vmem:[%s3034_s28 + $0x90] sm:$0xff]  ;;  %225 = vst.msk [vmem:[#allocation2 + $0x50] sm:$0xff] %vm214_vm0, %v3151_v26 }
  0x26   : > { %v263_v29 = vld [vmem:[%s3034_s28 + $0xc1] sm:$0xff]  ;;  %v264_v30 = vld [vmem:[%s3034_s28 + $0xc9] sm:$0xff]  ;;  %226 = vst.msk [vmem:[#allocation2 + $0x58] sm:$0xff] %vm214_vm0, %v3154_v27  ;;  %227 = vst.msk [vmem:[#allocation2 + $0x60] sm:$0xff] %vm214_vm0, %v3157_v28 }
  0x27   : > { %323 = vrot.lane.b32.xlu0 %v3061_v6, %s2949_s29  ;;  %325 = vrot.lane.b32.xlu1 %v3064_v7, %s2949_s29  ;;  %v3168_v31 = vld [vmem:[%s3034_s28 + $0x98] sm:$0xff]  ;;  %v3171_v32 = vld [vmem:[%s3034_s28 + $0xa8] sm:$0xff] }
  0x28   : > { %v3174_v33 = vld [vmem:[%s3034_s28 + $0xb0] sm:$0xff]  ;;  %228 = vst.msk [vmem:[#allocation2 + $0x68] sm:$0xff] %vm214_vm0, %v3168_v31  ;;  %229 = vst.msk [vmem:[#allocation2 + $0x70] sm:$0xff] %vm214_vm0, %v3171_v32  ;;  %v3187_v34 = vld [vmem:[%s3034_s28 + $0xc0] sm:$0xff] }
  0x29   : > { %230 = vst.msk [vmem:[#allocation2 + $0x78] sm:$0xff] %vm214_vm0, %v3174_v33  ;;  %v3190_v35 = vld [vmem:[%s3034_s28 + $0xc8] sm:$0xff]  ;;  %231 = vst.msk [vmem:[#allocation2 + $0x80] sm:$0xff] %vm214_vm0, %v3187_v34  ;;  %v3197_v36 = vld [vmem:[%s3034_s28 + $0xd8] sm:$0xff] }
  0x2a   : > { %232 = vst.msk [vmem:[#allocation2 + $0x88] sm:$0xff] %vm214_vm0, %v3190_v35  ;;  %v3200_v37 = vld [vmem:[%s3034_s28 + $0xe0] sm:$0xff]  ;;  %v3203_v38 = vld [vmem:[%s3034_s28 + $0xf0] sm:$0xff]  ;;  %233 = vst.msk [vmem:[#allocation2 + $0x90] sm:$0xff] %vm214_vm0, %v3197_v36 }
  0x2b   : > { %327 = vrot.lane.b32.xlu0 %v3071_v8, %s2949_s29  ;;  %329 = vrot.lane.b32.xlu1 %v3074_v9, %s2949_s29  ;;  %234 = vst.msk [vmem:[#allocation2 + $0x98] sm:$0xff] %vm214_vm0, %v3200_v37  ;;  %235 = vst.msk [vmem:[#allocation2 + $0xa0] sm:$0xff] %vm214_vm0, %v3203_v38  ;;  %v3212_v39 = vld [vmem:[%s3034_s28 + $0xf8] sm:$0xff]  ;;  %v3215_v40 = vld [vmem:[%s3034_s28 + $0x108] sm:$0xff] }
  0x2c   : > { %v3218_v41 = vld [vmem:[%s3034_s28 + $0x110] sm:$0xff]  ;;  %236 = vst.msk [vmem:[#allocation2 + $0xa8] sm:$0xff] %vm214_vm0, %v3212_v39  ;;  %237 = vst.msk [vmem:[#allocation2 + $0xb0] sm:$0xff] %vm214_vm0, %v3215_v40  ;;  %v265_v42 = vld [vmem:[%s3034_s28 + $0xd9] sm:$0xff] }
  0x2d   : > { %238 = vst.msk [vmem:[#allocation2 + $0xb8] sm:$0xff] %vm214_vm0, %v3218_v41  ;;  %v266_v43 = vld [vmem:[%s3034_s28 + $0xe1] sm:$0xff]  ;;  %v267_v46 = vld [vmem:[%s3034_s28 + $0xf1] sm:$0xff]  ;;  %v268_v47 = vld [vmem:[%s3034_s28 + $0xf9] sm:$0xff] }
  0x2e   : > { %v3231_v44 = vld [vmem:[%s3034_s28 + $0x120] sm:$0xff]  ;;  %v3236_v45 = vld [vmem:[%s3034_s28 + $0x128] sm:$0xff]  ;;  %v208_v48 = vld [vmem:[%s3034_s28 + $0x138] sm:$0xff] }
  0x2f   : > { %331 = vrot.lane.b32.xlu0 %v3081_v10, %s2949_s29  ;;  %333 = vrot.lane.b32.xlu1 %v3084_v11, %s2949_s29  ;;  %239 = vst.msk [vmem:[#allocation2 + $0xc0] sm:$0xff] %vm214_vm0, %v3231_v44  ;;  %240 = vst.msk [vmem:[#allocation2 + $0xc8] sm:$0xff] %vm214_vm0, %v3236_v45  ;;  %v209_v49 = vld [vmem:[%s3034_s28 + $0x140] sm:$0xff]  ;;  %v269_v50 = vld [vmem:[%s3034_s28 + $0x109] sm:$0xff] }
  0x30   : > { %241 = vst.msk [vmem:[#allocation2 + $0xd0] sm:$0xff] %vm214_vm0, %v208_v48  ;;  %242 = vst.msk [vmem:[#allocation2 + $0xd8] sm:$0xff] %vm214_vm0, %v209_v49  ;;  %v270_v51 = vld [vmem:[%s3034_s28 + $0x111] sm:$0xff]  ;;  %v271_v54 = vld [vmem:[%s3034_s28 + $0x121] sm:$0xff] }
  0x31   : > { %v210_v52 = vld [vmem:[%s3034_s28 + $0x150] sm:$0xff]  ;;  %v211_v53 = vld [vmem:[%s3034_s28 + $0x158] sm:$0xff]  ;;  %v212_v56 = vld [vmem:[%s3034_s28 + $0x168] sm:$0xff] }
  0x32   : > { %243 = vst.msk [vmem:[#allocation2 + $0xe0] sm:$0xff] %vm214_vm0, %v210_v52  ;;  %244 = vst.msk [vmem:[#allocation2 + $0xe8] sm:$0xff] %vm214_vm0, %v211_v53  ;;  %v272_v55 = vld [vmem:[%s3034_s28 + $0x129] sm:$0xff]  ;;  %v273_v58 = vld [vmem:[%s3034_s28 + $0x139] sm:$0xff] }
  0x33   : > { %335 = vrot.lane.b32.xlu0 %v3095_v14, %s2949_s29  ;;  %337 = vrot.lane.b32.xlu1 %v3098_v15, %s2949_s29  ;;  %245 = vst.msk [vmem:[#allocation2 + $0xf0] sm:$0xff] %vm214_vm0, %v212_v56  ;;  %v213_v57 = vld [vmem:[%s3034_s28 + $0x170] sm:$0xff]  ;;  %v274_v59 = vld [vmem:[%s3034_s28 + $0x141] sm:$0xff] }
  0x34   : > { %246 = vst.msk [vmem:[#allocation2 + $0xf8] sm:$0xff] %vm214_vm0, %v213_v57  ;;  %v275_v60 = vld [vmem:[%s3034_s28 + $0x151] sm:$0xff]  ;;  %v276_v61 = vld [vmem:[%s3034_s28 + $0x159] sm:$0xff]  ;;  %v277_v62 = vld [vmem:[%s3034_s28 + $0x169] sm:$0xff] }
  0x35   : > { %v278_v63 = vld [vmem:[%s3034_s28 + $0x171] sm:$0xff]  ;;  %v440_v0 = vld [vmem:[%s3034_s28 + $0x2] sm:$0xff]  ;;  %v3283_v12 = vld [vmem:[%s3034_s28 + $0x1a] sm:$0xff] }
  0x36   : > { %v441_v2 = vld [vmem:[%s3034_s28 + $0xa] sm:$0xff]  ;;  %v3286_v16 = vld [vmem:[%s3034_s28 + $0x22] sm:$0xff]  ;;  %v3323_v48 = vld [vmem:[%s3034_s28 + $0x7a] sm:$0xff] }
  0x37   : > { %339 = vrot.lane.b32.xlu0 %v3109_v18, %s2949_s29  ;;  %341 = vrot.lane.b32.xlu1 %v3124_v21, %s2949_s29  ;;  %v3326_v49 = vld [vmem:[%s3034_s28 + $0x82] sm:$0xff]  ;;  %v3343_v52 = vld [vmem:[%s3034_s28 + $0xaa] sm:$0xff] }
  0x38   : > { %v3346_v53 = vld [vmem:[%s3034_s28 + $0xb2] sm:$0xff]  ;;  %v458_v56 = vld [vmem:[%s3034_s28 + $0xda] sm:$0xff]  ;;  %v459_v57 = vld [vmem:[%s3034_s28 + $0xe2] sm:$0xff] }
  0x3b   : > { %343 = vrot.lane.b32.xlu0 %v263_v29, %s2949_s29  ;;  %345 = vrot.lane.b32.xlu1 %v264_v30, %s2949_s29  ;;  %v3293_v29 = vld [vmem:[%s3034_s28 + $0x32] sm:$0xff]  ;;  %v3296_v30 = vld [vmem:[%s3034_s28 + $0x3a] sm:$0xff] }
  0x3f   : > { %347 = vrot.lane.b32.xlu0 %v265_v42, %s2949_s29  ;;  %349 = vrot.lane.b32.xlu1 %v266_v43, %s2949_s29  ;;  %v3303_v42 = vld [vmem:[%s3034_s28 + $0x4a] sm:$0xff]  ;;  %v3306_v43 = vld [vmem:[%s3034_s28 + $0x52] sm:$0xff] }
  0x43   : > { %351 = vrot.lane.b32.xlu0 %v267_v46, %s2949_s29  ;;  %353 = vrot.lane.b32.xlu1 %v268_v47, %s2949_s29  ;;  %v3313_v46 = vld [vmem:[%s3034_s28 + $0x62] sm:$0xff]  ;;  %v3316_v47 = vld [vmem:[%s3034_s28 + $0x6a] sm:$0xff] }
  0x47   : > { %355 = vrot.lane.b32.xlu0 %v269_v50, %s2949_s29  ;;  %357 = vrot.lane.b32.xlu1 %v270_v51, %s2949_s29  ;;  %v3333_v50 = vld [vmem:[%s3034_s28 + $0x92] sm:$0xff]  ;;  %v3336_v51 = vld [vmem:[%s3034_s28 + $0x9a] sm:$0xff] }
  0x4b   : > { %359 = vrot.lane.b32.xlu0 %v271_v54, %s2949_s29  ;;  %361 = vrot.lane.b32.xlu1 %v272_v55, %s2949_s29  ;;  %v3353_v54 = vld [vmem:[%s3034_s28 + $0xc2] sm:$0xff]  ;;  %v3356_v55 = vld [vmem:[%s3034_s28 + $0xca] sm:$0xff] }
  0x4f   : > { %363 = vrot.lane.b32.xlu0 %v273_v58, %s2949_s29  ;;  %365 = vrot.lane.b32.xlu1 %v274_v59, %s2949_s29  ;;  %v460_v58 = vld [vmem:[%s3034_s28 + $0xf2] sm:$0xff]  ;;  %v461_v59 = vld [vmem:[%s3034_s28 + $0xfa] sm:$0xff] }
  0x53   : > { %367 = vrot.lane.b32.xlu0 %v275_v60, %s2949_s29  ;;  %369 = vrot.lane.b32.xlu1 %v276_v61, %s2949_s29  ;;  %v462_v60 = vld [vmem:[%s3034_s28 + $0x10a] sm:$0xff]  ;;  %v463_v61 = vld [vmem:[%s3034_s28 + $0x112] sm:$0xff] }
  0x57   : > { %371 = vrot.lane.b32.xlu0 %v277_v62, %s2949_s29  ;;  %373 = vrot.lane.b32.xlu1 %v278_v63, %s2949_s29  ;;  %v464_v62 = vld [vmem:[%s3034_s28 + $0x122] sm:$0xff]  ;;  %v465_v63 = vld [vmem:[%s3034_s28 + $0x12a] sm:$0xff] }
  0x5b   : > { %504 = vrot.lane.b32.xlu0 %v440_v0, %s2950_s30  ;;  %506 = vrot.lane.b32.xlu1 %v441_v2, %s2950_s30  ;;  %v466_v0 = vld [vmem:[%s3034_s28 + $0x13a] sm:$0xff]  ;;  %v467_v2 = vld [vmem:[%s3034_s28 + $0x142] sm:$0xff] }
  0x5f   : > { %508 = vrot.lane.b32.xlu0 %v3283_v12, %s2950_s30  ;;  %510 = vrot.lane.b32.xlu1 %v3286_v16, %s2950_s30 }
  0x63   : > { %512 = vrot.lane.b32.xlu0 %v3293_v29, %s2950_s30  ;;  %514 = vrot.lane.b32.xlu1 %v3296_v30, %s2950_s30 }
  0x67   : > { %516 = vrot.lane.b32.xlu0 %v3303_v42, %s2950_s30  ;;  %518 = vrot.lane.b32.xlu1 %v3306_v43, %s2950_s30 }
  0x6b   : > { %520 = vrot.lane.b32.xlu0 %v3313_v46, %s2950_s30  ;;  %522 = vrot.lane.b32.xlu1 %v3316_v47, %s2950_s30 }
  0x6f   : > { %524 = vrot.lane.b32.xlu0 %v3323_v48, %s2950_s30  ;;  %526 = vrot.lane.b32.xlu1 %v3326_v49, %s2950_s30 }
  0x73   : > { %528 = vrot.lane.b32.xlu0 %v3333_v50, %s2950_s30  ;;  %530 = vrot.lane.b32.xlu1 %v3336_v51, %s2950_s30 }
  0x77   : > { %532 = vrot.lane.b32.xlu0 %v3343_v52, %s2950_s30  ;;  %534 = vrot.lane.b32.xlu1 %v3346_v53, %s2950_s30 }
  0x7b   : > { %536 = vrot.lane.b32.xlu0 %v3353_v54, %s2950_s30  ;;  %538 = vrot.lane.b32.xlu1 %v3356_v55, %s2950_s30 }
  0x7f   : > { %540 = vrot.lane.b32.xlu0 %v458_v56, %s2950_s30  ;;  %542 = vrot.lane.b32.xlu1 %v459_v57, %s2950_s30 }
  0x83   : > { %544 = vrot.lane.b32.xlu0 %v460_v58, %s2950_s30  ;;  %546 = vrot.lane.b32.xlu1 %v461_v59, %s2950_s30  ;;  %v468_v58 = vld [vmem:[%s3034_s28 + $0x152] sm:$0xff]  ;;  %v469_v59 = vld [vmem:[%s3034_s28 + $0x15a] sm:$0xff] }
  0x87   : > { %548 = vrot.lane.b32.xlu0 %v462_v60, %s2950_s30  ;;  %550 = vrot.lane.b32.xlu1 %v463_v61, %s2950_s30 }
  0x8b   : > { %552 = vrot.lane.b32.xlu0 %v464_v62, %s2950_s30  ;;  %554 = vrot.lane.b32.xlu1 %v465_v63, %s2950_s30  ;;  %v470_v62 = vld [vmem:[%s3034_s28 + $0x16a] sm:$0xff]  ;;  %v471_v63 = vld [vmem:[%s3034_s28 + $0x172] sm:$0xff] }
  0x8d   : > { %v312_v56 = vpop.permute.xlu0 %311  ;;  %v316_v57 = vpop.permute.xlu1 %315 }
  0x8e   : > { %408 = vst.msk [vmem:[#allocation2] sm:$0xff] %vm407_vm1, %v312_v56  ;;  %410 = vst.msk [vmem:[#allocation2 + $0x10] sm:$0xff] %vm407_vm1, %v316_v57 }
  0x8f   : > { %556 = vrot.lane.b32.xlu0 %v466_v0, %s2950_s30  ;;  %558 = vrot.lane.b32.xlu1 %v467_v2, %s2950_s30 }
  0x91   : > { %v314_v60 = vpop.permute.xlu0 %313  ;;  %v318_v61 = vpop.permute.xlu1 %317 }
  0x92   : > { %409 = vst.msk [vmem:[#allocation2 + $0x8] sm:$0xff] %vm407_vm1, %v314_v60  ;;  %411 = vst.msk [vmem:[#allocation2 + $0x18] sm:$0xff] %vm407_vm1, %v318_v61 }
  0x93   : > { %560 = vrot.lane.b32.xlu0 %v468_v58, %s2950_s30  ;;  %562 = vrot.lane.b32.xlu1 %v469_v59, %s2950_s30 }
  0x95   : > { %v320_v56 = vpop.permute.xlu0 %319  ;;  %v322_v57 = vpop.permute.xlu1 %321 }
  0x96   : > { %412 = vst.msk [vmem:[#allocation2 + $0x20] sm:$0xff] %vm407_vm1, %v320_v56  ;;  %413 = vst.msk [vmem:[#allocation2 + $0x28] sm:$0xff] %vm407_vm1, %v322_v57 }
  0x97   : > { %564 = vrot.lane.b32.xlu0 %v470_v62, %s2950_s30  ;;  %566 = vrot.lane.b32.xlu1 %v471_v63, %s2950_s30  ;;  %s2954_s30 = smov 48  }
  0x99   : > { %v324_v0 = vpop.permute.xlu0 %323  ;;  %v326_v2 = vpop.permute.xlu1 %325 }
  0x9a   : > { %414 = vst.msk [vmem:[#allocation2 + $0x30] sm:$0xff] %vm407_vm1, %v324_v0  ;;  %415 = vst.msk [vmem:[#allocation2 + $0x38] sm:$0xff] %vm407_vm1, %v326_v2  ;;  %v1825_v0 = vld [vmem:[%s4229_s1] sm:$0xff]  ;;  %v1826_v2 = vld [vmem:[%s4229_s1 + $0x8] sm:$0xff] }
  0x9b   : > { %698 = vrot.lane.b32.xlu0 %v3092_v13, %s2951_s4  ;;  %700 = vrot.lane.b32.xlu1 %v3106_v17, %s2951_s4 }
  0x9d   : > { %v328_v58 = vpop.permute.xlu0 %327  ;;  %v330_v59 = vpop.permute.xlu1 %329 }
  0x9e   : > { %416 = vst.msk [vmem:[#allocation2 + $0x40] sm:$0xff] %vm407_vm1, %v328_v58  ;;  %417 = vst.msk [vmem:[#allocation2 + $0x48] sm:$0xff] %vm407_vm1, %v330_v59  ;;  %v2811_v58 = vpack.c.bf16 %v1826_v2, %v1825_v0  ;;  %v1832_v0 = vld [vmem:[%s4229_s1 + $0x38] sm:$0xff] }
  0x9f   : > { %702 = vrot.lane.b32.xlu0 %v3114_v19, %s2951_s4  ;;  %704 = vrot.lane.b32.xlu1 %v3117_v20, %s2951_s4 }
  0xa0   : > { %2812 = vmatprep.subr.bf16.mxu0 %v2811_v58  ;;  %2827 = vmatprep.subr.bf16.mxu1 %v2811_v58 }
  0xa1   : > { %v332_v60 = vpop.permute.xlu0 %331  ;;  %v334_v61 = vpop.permute.xlu1 %333  ;;  %2814 = vmatpush3.bf16.msra.mxu0 %v2811_v58  ;;  %2832 = vmatpush3.bf16.msra.mxu1 %v2811_v58 }
  0xa2   : > { %418 = vst.msk [vmem:[#allocation2 + $0x50] sm:$0xff] %vm407_vm1, %v332_v60  ;;  %419 = vst.msk [vmem:[#allocation2 + $0x58] sm:$0xff] %vm407_vm1, %v334_v61  ;;  %v1827_v61 = vld [vmem:[%s4229_s1 + $0x10] sm:$0xff] }
  0xa3   : > { %706 = vrot.lane.b32.xlu0 %v3131_v22, %s2951_s4  ;;  %708 = vrot.lane.b32.xlu1 %v3136_v23, %s2951_s4 }
  0xa5   : > { %v336_v13 = vpop.permute.xlu0 %335  ;;  %v338_v17 = vpop.permute.xlu1 %337 }
  0xa6   : > { %420 = vst.msk [vmem:[#allocation2 + $0x60] sm:$0xff] %vm407_vm1, %v336_v13  ;;  %421 = vst.msk [vmem:[#allocation2 + $0x68] sm:$0xff] %vm407_vm1, %v338_v17  ;;  %v1828_v13 = vld [vmem:[%s4229_s1 + $0x18] sm:$0xff] }
  0xa7   : > { %710 = vrot.lane.b32.xlu0 %v3139_v24, %s2951_s4  ;;  %712 = vrot.lane.b32.xlu1 %v3142_v25, %s2951_s4 }
  0xa9   : > { %v340_v62 = vpop.permute.xlu0 %339  ;;  %v342_v63 = vpop.permute.xlu1 %341 }
  0xaa   : > { %422 = vst.msk [vmem:[#allocation2 + $0x70] sm:$0xff] %vm407_vm1, %v340_v62  ;;  %423 = vst.msk [vmem:[#allocation2 + $0x78] sm:$0xff] %vm407_vm1, %v342_v63  ;;  %v1829_v62 = vld [vmem:[%s4229_s1 + $0x20] sm:$0xff]  ;;  %v1830_v63 = vld [vmem:[%s4229_s1 + $0x28] sm:$0xff] }
  0xab   : > { %714 = vrot.lane.b32.xlu0 %v3151_v26, %s2951_s4  ;;  %716 = vrot.lane.b32.xlu1 %v3154_v27, %s2951_s4 }
  0xad   : > { %v344_v56 = vpop.permute.xlu0 %343  ;;  %v346_v57 = vpop.permute.xlu1 %345 }
  0xae   : > { %424 = vst.msk [vmem:[#allocation2 + $0x80] sm:$0xff] %vm407_vm1, %v344_v56  ;;  %425 = vst.msk [vmem:[#allocation2 + $0x88] sm:$0xff] %vm407_vm1, %v346_v57  ;;  %v1831_v57 = vld [vmem:[%s4229_s1 + $0x30] sm:$0xff] }
  0xaf   : > { %891 = vrot.lane.b32.xlu0 %v3038_v1, %s2952_s9  ;;  %893 = vrot.lane.b32.xlu1 %v3045_v3, %s2952_s9  ;;  %v2815_v1 = vpack.c.bf16 %v1828_v13, %v1827_v61 }
  0xb1   : > { %v348_v59 = vpop.permute.xlu0 %347  ;;  %v350_v60 = vpop.permute.xlu1 %349  ;;  %2816 = vmatprep.subr.bf16.mxu0 %v2815_v1  ;;  %2828 = vmatprep.subr.bf16.mxu1 %v2815_v1 }
  0xb2   : > { %426 = vst.msk [vmem:[#allocation2 + $0x90] sm:$0xff] %vm407_vm1, %v348_v59  ;;  %427 = vst.msk [vmem:[#allocation2 + $0x98] sm:$0xff] %vm407_vm1, %v350_v60  ;;  %2818 = vmatpush3.bf16.msra.mxu0 %v2815_v1  ;;  %2833 = vmatpush3.bf16.msra.mxu1 %v2815_v1 }
  0xb3   : > { %1084 = vrot.lane.b32.xlu0 %v3283_v12, %s2953_s20  ;;  %1086 = vrot.lane.b32.xlu1 %v3286_v16, %s2953_s20  ;;  %v2819_v12 = vpack.c.bf16 %v1830_v63, %v1829_v62 }
  0xb5   : > { %v352_v3 = vpop.permute.xlu0 %351  ;;  %v354_v17 = vpop.permute.xlu1 %353  ;;  %2820 = vmatprep.subr.bf16.mxu0 %v2819_v12  ;;  %2829 = vmatprep.subr.bf16.mxu1 %v2819_v12 }
  0xb6   : > { %428 = vst.msk [vmem:[#allocation2 + $0xa0] sm:$0xff] %vm407_vm1, %v352_v3  ;;  %429 = vst.msk [vmem:[#allocation2 + $0xa8] sm:$0xff] %vm407_vm1, %v354_v17  ;;  %2822 = vmatpush3.bf16.msra.mxu0 %v2819_v12  ;;  %2834 = vmatpush3.bf16.msra.mxu1 %v2819_v12 }
  0xb7   : > { %1278 = vrot.lane.b32.xlu0 %v3114_v19, %s2954_s30  ;;  %1280 = vrot.lane.b32.xlu1 %v3117_v20, %s2954_s30  ;;  %v2823_v19 = vpack.c.bf16 %v1832_v0, %v1831_v57 }
  0xb9   : > { %v356_v16 = vpop.permute.xlu0 %355  ;;  %v358_v56 = vpop.permute.xlu1 %357  ;;  %2824 = vmatprep.subr.bf16.mxu0 %v2823_v19  ;;  %2830 = vmatprep.subr.bf16.mxu1 %v2823_v19 }
  0xba   : > { %430 = vst.msk [vmem:[#allocation2 + $0xb0] sm:$0xff] %vm407_vm1, %v356_v16  ;;  %431 = vst.msk [vmem:[#allocation2 + $0xb8] sm:$0xff] %vm407_vm1, %v358_v56  ;;  %2826 = vmatpush3.bf16.msra.mxu0 %v2823_v19  ;;  %2835 = vmatpush3.bf16.msra.mxu1 %v2823_v19 }
  0xbb   : > { %1471 = vrot.lane.b32.xlu0 %v3051_v4, %s2955_s10  ;;  %895 = vrot.lane.b32.xlu1 %v3051_v4, %s2952_s9  ;;  %v1833_v4 = vld [vmem:[%s4229_s1 + $0x40] sm:$0xff] }
  0xbc   : > { %2761 = vmatprep.subr.mxu0 %v1833_v4  ;;  %2831 = vmatprep.subr.mxu1 %v1833_v4 }
  0xbd   : > { %v360_v20 = vpop.permute.xlu0 %359  ;;  %v362_v2 = vpop.permute.xlu1 %361 }
  0xbe   : > { %432 = vst.msk [vmem:[#allocation2 + $0xc0] sm:$0xff] %vm407_vm1, %v360_v20  ;;  %433 = vst.msk [vmem:[#allocation2 + $0xc8] sm:$0xff] %vm407_vm1, %v362_v2  ;;  %2762 = vmatpush3.msra.mxu0 %v1833_v4  ;;  %2836 = vmatpush3.msra.mxu1 %v1833_v4 }
  0xbf   : > { %1473 = vrot.lane.b32.xlu0 %v3054_v5, %s2955_s10  ;;  %1664 = vrot.lane.b32.xlu1 %v3293_v29, %s2956_s11 }
  0xc1   : > { %v364_v58 = vpop.permute.xlu0 %363  ;;  %v366_v59 = vpop.permute.xlu1 %365 }
  0xc2   : > { %434 = vst.msk [vmem:[#allocation2 + $0xd0] sm:$0xff] %vm407_vm1, %v364_v58  ;;  %435 = vst.msk [vmem:[#allocation2 + $0xd8] sm:$0xff] %vm407_vm1, %v366_v59 }
  0xc3   : > { %897 = vrot.lane.b32.xlu0 %v3054_v5, %s2952_s9  ;;  %1088 = vrot.lane.b32.xlu1 %v3293_v29, %s2953_s20 }
  0xc5   : > { %v368_v60 = vpop.permute.xlu0 %367  ;;  %v370_v61 = vpop.permute.xlu1 %369 }
  0xc6   : > { %436 = vst.msk [vmem:[#allocation2 + $0xe0] sm:$0xff] %vm407_vm1, %v368_v60  ;;  %437 = vst.msk [vmem:[#allocation2 + $0xe8] sm:$0xff] %vm407_vm1, %v370_v61 }
  0xc7   : > { %1666 = vrot.lane.b32.xlu0 %v3296_v30, %s2956_s11  ;;  %1090 = vrot.lane.b32.xlu1 %v3296_v30, %s2953_s20 }
  0xc9   : > { %v372_v13 = vpop.permute.xlu0 %371  ;;  %v374_v1 = vpop.permute.xlu1 %373 }
  0xca   : > { %438 = vst.msk [vmem:[#allocation2 + $0xf0] sm:$0xff] %vm407_vm1, %v372_v13  ;;  %439 = vst.msk [vmem:[#allocation2 + $0xf8] sm:$0xff] %vm407_vm1, %v374_v1 }
  0xcb   : > { %1282 = vrot.lane.b32.xlu0 %v3131_v22, %s2954_s30  ;;  %1284 = vrot.lane.b32.xlu1 %v3136_v23, %s2954_s30 }
  0xcd   : > { %v505_v5 = vpop.permute.xlu0 %504  ;;  %v507_v29 = vpop.permute.xlu1 %506 }
  0xce   : > { %601 = vst.msk [vmem:[#allocation2] sm:$0xff] %vm600_vm2, %v505_v5  ;;  %602 = vst.msk [vmem:[#allocation2 + $0x8] sm:$0xff] %vm600_vm2, %v507_v29 }
  0xcf   : > { %1475 = vrot.lane.b32.xlu0 %v3061_v6, %s2955_s10  ;;  %899 = vrot.lane.b32.xlu1 %v3061_v6, %s2952_s9 }
  0xd1   : > { %v509_v30 = vpop.permute.xlu0 %508  ;;  %v511_v3 = vpop.permute.xlu1 %510 }
  0xd2   : > { %603 = vst.msk [vmem:[#allocation2 + $0x10] sm:$0xff] %vm600_vm2, %v509_v30  ;;  %604 = vst.msk [vmem:[#allocation2 + $0x18] sm:$0xff] %vm600_vm2, %v511_v3 }
  0xd3   : > { %1477 = vrot.lane.b32.xlu0 %v3064_v7, %s2955_s10  ;;  %1668 = vrot.lane.b32.xlu1 %v3303_v42, %s2956_s11 }
  0xd5   : > { %v513_v22 = vpop.permute.xlu0 %512  ;;  %v515_v23 = vpop.permute.xlu1 %514 }
  0xd6   : > { %605 = vst.msk [vmem:[#allocation2 + $0x20] sm:$0xff] %vm600_vm2, %v513_v22  ;;  %606 = vst.msk [vmem:[#allocation2 + $0x28] sm:$0xff] %vm600_vm2, %v515_v23 }
  0xd7   : > { %901 = vrot.lane.b32.xlu0 %v3064_v7, %s2952_s9  ;;  %1092 = vrot.lane.b32.xlu1 %v3303_v42, %s2953_s20 }
  0xd9   : > { %v517_v6 = vpop.permute.xlu0 %516  ;;  %v519_v17 = vpop.permute.xlu1 %518 }
  0xda   : > { %607 = vst.msk [vmem:[#allocation2 + $0x30] sm:$0xff] %vm600_vm2, %v517_v6  ;;  %608 = vst.msk [vmem:[#allocation2 + $0x38] sm:$0xff] %vm600_vm2, %v519_v17 }
  0xdb   : > { %1670 = vrot.lane.b32.xlu0 %v3306_v43, %s2956_s11  ;;  %1094 = vrot.lane.b32.xlu1 %v3306_v43, %s2953_s20 }
  0xdd   : > { %v521_v62 = vpop.permute.xlu0 %520  ;;  %v523_v63 = vpop.permute.xlu1 %522 }
  0xde   : > { %609 = vst.msk [vmem:[#allocation2 + $0x40] sm:$0xff] %vm600_vm2, %v521_v62  ;;  %610 = vst.msk [vmem:[#allocation2 + $0x48] sm:$0xff] %vm600_vm2, %v523_v63 }
  0xdf   : > { %1286 = vrot.lane.b32.xlu0 %v3139_v24, %s2954_s30  ;;  %1288 = vrot.lane.b32.xlu1 %v3142_v25, %s2954_s30 }
  0xe1   : > { %v525_v7 = vpop.permute.xlu0 %524  ;;  %v527_v42 = vpop.permute.xlu1 %526 }
  0xe2   : > { %611 = vst.msk [vmem:[#allocation2 + $0x50] sm:$0xff] %vm600_vm2, %v525_v7  ;;  %612 = vst.msk [vmem:[#allocation2 + $0x58] sm:$0xff] %vm600_vm2, %v527_v42 }
  0xe3   : > { %1479 = vrot.lane.b32.xlu0 %v3071_v8, %s2955_s10  ;;  %903 = vrot.lane.b32.xlu1 %v3071_v8, %s2952_s9 }
  0xe5   : > { %v529_v43 = vpop.permute.xlu0 %528  ;;  %v531_v12 = vpop.permute.xlu1 %530 }
  0xe6   : > { %613 = vst.msk [vmem:[#allocation2 + $0x60] sm:$0xff] %vm600_vm2, %v529_v43  ;;  %614 = vst.msk [vmem:[#allocation2 + $0x68] sm:$0xff] %vm600_vm2, %v531_v12 }
  0xe7   : > { %1481 = vrot.lane.b32.xlu0 %v3074_v9, %s2955_s10  ;;  %1672 = vrot.lane.b32.xlu1 %v3313_v46, %s2956_s11 }
  0xe9   : > { %v533_v24 = vpop.permute.xlu0 %532  ;;  %v535_v25 = vpop.permute.xlu1 %534 }
  0xea   : > { %615 = vst.msk [vmem:[#allocation2 + $0x70] sm:$0xff] %vm600_vm2, %v533_v24  ;;  %616 = vst.msk [vmem:[#allocation2 + $0x78] sm:$0xff] %vm600_vm2, %v535_v25 }
  0xeb   : > { %905 = vrot.lane.b32.xlu0 %v3074_v9, %s2952_s9  ;;  %1096 = vrot.lane.b32.xlu1 %v3313_v46, %s2953_s20 }
  0xed   : > { %v537_v8 = vpop.permute.xlu0 %536  ;;  %v539_v16 = vpop.permute.xlu1 %538 }
  0xee   : > { %617 = vst.msk [vmem:[#allocation2 + $0x80] sm:$0xff] %vm600_vm2, %v537_v8  ;;  %618 = vst.msk [vmem:[#allocation2 + $0x88] sm:$0xff] %vm600_vm2, %v539_v16 }
  0xef   : > { %1674 = vrot.lane.b32.xlu0 %v3316_v47, %s2956_s11  ;;  %1098 = vrot.lane.b32.xlu1 %v3316_v47, %s2953_s20 }
  0xf1   : > { %v541_v56 = vpop.permute.xlu0 %540  ;;  %v543_v57 = vpop.permute.xlu1 %542 }
  0xf2   : > { %619 = vst.msk [vmem:[#allocation2 + $0x90] sm:$0xff] %vm600_vm2, %v541_v56  ;;  %620 = vst.msk [vmem:[#allocation2 + $0x98] sm:$0xff] %vm600_vm2, %v543_v57 }
  0xf3   : > { %1290 = vrot.lane.b32.xlu0 %v3151_v26, %s2954_s30  ;;  %1292 = vrot.lane.b32.xlu1 %v3154_v27, %s2954_s30 }
  0xf5   : > { %v545_v9 = vpop.permute.xlu0 %544  ;;  %v547_v46 = vpop.permute.xlu1 %546 }
  0xf6   : > { %621 = vst.msk [vmem:[#allocation2 + $0xa0] sm:$0xff] %vm600_vm2, %v545_v9  ;;  %622 = vst.msk [vmem:[#allocation2 + $0xa8] sm:$0xff] %vm600_vm2, %v547_v46  ;;  %v2649_v46 = vld [vmem:[%s3034_s28 + $0xda] sm:$0xff] }
  0xf7   : > { %1483 = vrot.lane.b32.xlu0 %v3081_v10, %s2955_s10  ;;  %907 = vrot.lane.b32.xlu1 %v3081_v10, %s2952_s9 }
  0xf9   : > { %v549_v47 = vpop.permute.xlu0 %548  ;;  %v551_v0 = vpop.permute.xlu1 %550 }
  0xfa   : > { %623 = vst.msk [vmem:[#allocation2 + $0xb0] sm:$0xff] %vm600_vm2, %v549_v47  ;;  %624 = vst.msk [vmem:[#allocation2 + $0xb8] sm:$0xff] %vm600_vm2, %v551_v0 }
  0xfb   : > { %1485 = vrot.lane.b32.xlu0 %v3084_v11, %s2955_s10  ;;  %1676 = vrot.lane.b32.xlu1 %v3323_v48, %s2956_s11 }
  0xfd   : > { %v553_v26 = vpop.permute.xlu0 %552  ;;  %v555_v27 = vpop.permute.xlu1 %554 }
  0xfe   : > { %625 = vst.msk [vmem:[#allocation2 + $0xc0] sm:$0xff] %vm600_vm2, %v553_v26  ;;  %626 = vst.msk [vmem:[#allocation2 + $0xc8] sm:$0xff] %vm600_vm2, %v555_v27 }
  0xff   : > { %909 = vrot.lane.b32.xlu0 %v3084_v11, %s2952_s9  ;;  %1100 = vrot.lane.b32.xlu1 %v3323_v48, %s2953_s20 }
 0x101   : > { %v557_v10 = vpop.permute.xlu0 %556  ;;  %v559_v19 = vpop.permute.xlu1 %558 }
 0x102   : > { %627 = vst.msk [vmem:[#allocation2 + $0xd0] sm:$0xff] %vm600_vm2, %v557_v10  ;;  %628 = vst.msk [vmem:[#allocation2 + $0xd8] sm:$0xff] %vm600_vm2, %v559_v19 }
 0x103   : > { %1678 = vrot.lane.b32.xlu0 %v3326_v49, %s2956_s11  ;;  %1102 = vrot.lane.b32.xlu1 %v3326_v49, %s2953_s20 }
 0x105   : > { %v561_v20 = vpop.permute.xlu0 %560  ;;  %v563_v2 = vpop.permute.xlu1 %562 }
 0x106   : > { %629 = vst.msk [vmem:[#allocation2 + $0xe0] sm:$0xff] %vm600_vm2, %v561_v20  ;;  %630 = vst.msk [vmem:[#allocation2 + $0xe8] sm:$0xff] %vm600_vm2, %v563_v2 }
 0x107   : > { %1294 = vrot.lane.b32.xlu0 %v3157_v28, %s2954_s30  ;;  %718 = vrot.lane.b32.xlu1 %v3157_v28, %s2951_s4 }
 0x109   : > { %v565_v11 = vpop.permute.xlu0 %564  ;;  %v567_v48 = vpop.permute.xlu1 %566 }
 0x10a   : > { %631 = vst.msk [vmem:[#allocation2 + $0xf0] sm:$0xff] %vm600_vm2, %v565_v11  ;;  %632 = vst.msk [vmem:[#allocation2 + $0xf8] sm:$0xff] %vm600_vm2, %v567_v48  ;;  %v2619_v48 = vld [vmem:[%s3034_s28 + $0xf1] sm:$0xff] }
 0x10b   : > { %1296 = vrot.lane.b32.xlu0 %v3168_v31, %s2954_s30  ;;  %1487 = vrot.lane.b32.xlu1 %v3095_v14, %s2955_s10 }
 0x10d   : > { %v699_v49 = vpop.permute.xlu0 %698  ;;  %v701_v4 = vpop.permute.xlu1 %700 }
 0x10e   : > { %795 = vst.msk [vmem:[#allocation2] sm:$0xff] %vm794_vm3, %v699_v49  ;;  %796 = vst.msk [vmem:[#allocation2 + $0x8] sm:$0xff] %vm794_vm3, %v701_v4 }
 0x10f   : > { %720 = vrot.lane.b32.xlu0 %v3168_v31, %s2951_s4  ;;  %911 = vrot.lane.b32.xlu1 %v3095_v14, %s2952_s9 }
 0x111   : > { %v703_v28 = vpop.permute.xlu0 %702  ;;  %v705_v58 = vpop.permute.xlu1 %704 }
 0x112   : > { %797 = vst.msk [vmem:[#allocation2 + $0x10] sm:$0xff] %vm794_vm3, %v703_v28  ;;  %798 = vst.msk [vmem:[#allocation2 + $0x18] sm:$0xff] %vm794_vm3, %v705_v58 }
 0x113   : > { %1489 = vrot.lane.b32.xlu0 %v3098_v15, %s2955_s10  ;;  %1680 = vrot.lane.b32.xlu1 %v3333_v50, %s2956_s11 }
 0x115   : > { %v707_v59 = vpop.permute.xlu0 %706  ;;  %v709_v60 = vpop.permute.xlu1 %708 }
 0x116   : > { %799 = vst.msk [vmem:[#allocation2 + $0x20] sm:$0xff] %vm794_vm3, %v707_v59  ;;  %800 = vst.msk [vmem:[#allocation2 + $0x28] sm:$0xff] %vm794_vm3, %v709_v60  ;;  %v2651_v60 = vld [vmem:[%s3034_s28 + $0xf2] sm:$0xff] }
 0x117   : > { %913 = vrot.lane.b32.xlu0 %v3098_v15, %s2952_s9  ;;  %1104 = vrot.lane.b32.xlu1 %v3333_v50, %s2953_s20 }
 0x119   : > { %v711_v14 = vpop.permute.xlu0 %710  ;;  %v713_v31 = vpop.permute.xlu1 %712 }
 0x11a   : > { %801 = vst.msk [vmem:[#allocation2 + $0x30] sm:$0xff] %vm794_vm3, %v711_v14  ;;  %802 = vst.msk [vmem:[#allocation2 + $0x38] sm:$0xff] %vm794_vm3, %v713_v31 }
 0x11b   : > { %1682 = vrot.lane.b32.xlu0 %v3336_v51, %s2956_s11  ;;  %1106 = vrot.lane.b32.xlu1 %v3336_v51, %s2953_s20 }
 0x11d   : > { %v715_v61 = vpop.permute.xlu0 %714  ;;  %v717_v13 = vpop.permute.xlu1 %716 }
 0x11e   : > { %803 = vst.msk [vmem:[#allocation2 + $0x40] sm:$0xff] %vm794_vm3, %v715_v61  ;;  %804 = vst.msk [vmem:[#allocation2 + $0x48] sm:$0xff] %vm794_vm3, %v717_v13 }
 0x11f   : > { %1298 = vrot.lane.b32.xlu0 %v3171_v32, %s2954_s30  ;;  %722 = vrot.lane.b32.xlu1 %v3171_v32, %s2951_s4 }
 0x121   : > { %v892_v15 = vpop.permute.xlu0 %891  ;;  %v894_v50 = vpop.permute.xlu1 %893 }
 0x122   : > { %988 = vst.msk [vmem:[#allocation2] sm:$0xff] %vm987_vm4, %v892_v15  ;;  %989 = vst.msk [vmem:[#allocation2 + $0x8] sm:$0xff] %vm987_vm4, %v894_v50 }
 0x123   : > { %1300 = vrot.lane.b32.xlu0 %v3174_v33, %s2954_s30  ;;  %1491 = vrot.lane.b32.xlu1 %v3109_v18, %s2955_s10 }
 0x125   : > { %v1085_v51 = vpop.permute.xlu0 %1084  ;;  %v1087_v1 = vpop.permute.xlu1 %1086 }
 0x126   : > { %1181 = vst.msk [vmem:[#allocation2] sm:$0xff] %vm1180_vm5, %v1085_v51  ;;  %1182 = vst.msk [vmem:[#allocation2 + $0x8] sm:$0xff] %vm1180_vm5, %v1087_v1 }
 0x127   : > { %724 = vrot.lane.b32.xlu0 %v3174_v33, %s2951_s4  ;;  %915 = vrot.lane.b32.xlu1 %v3109_v18, %s2952_s9 }
 0x129   : > { %v1279_v32 = vpop.permute.xlu0 %1278  ;;  %v1281_v5 = vpop.permute.xlu1 %1280 }
 0x12a   : > { %1375 = vst.msk [vmem:[#allocation2] sm:$0xff] %vm1374_vm6, %v1279_v32  ;;  %1376 = vst.msk [vmem:[#allocation2 + $0x8] sm:$0xff] %vm1374_vm6, %v1281_v5 }
 0x12b   : > { %1493 = vrot.lane.b32.xlu0 %v3124_v21, %s2955_s10  ;;  %1684 = vrot.lane.b32.xlu1 %v3343_v52, %s2956_s11 }
 0x12d   : > { %v1472_v29 = vpop.permute.xlu0 %1471  ;;  %v896_v30 = vpop.permute.xlu1 %895 }
 0x12e   : > { %1568 = vst.msk [vmem:[#allocation2] sm:$0xff] %vm1567_vm7, %v1472_v29  ;;  %v2621_v29 = vld [vmem:[%s3034_s28 + $0x109] sm:$0xff] }
 0x12f   : > { %990 = vst.msk [vmem:[#allocation2 + $0x10] sm:$0xff] %vm987_vm4, %v896_v30  ;;  %917 = vrot.lane.b32.xlu0 %v3124_v21, %s2952_s9  ;;  %1108 = vrot.lane.b32.xlu1 %v3343_v52, %s2953_s20  ;;  %v2615_v21 = vld [vmem:[%s3034_s28 + $0xc1] sm:$0xff] }
 0x131   : > { %v1474_v18 = vpop.permute.xlu0 %1473  ;;  %v1665_v33 = vpop.permute.xlu1 %1664 }
 0x132   : > { %1569 = vst.msk [vmem:[#allocation2 + $0x8] sm:$0xff] %vm1567_vm7, %v1474_v18 }
 0x133   : > { %1761 = vst.msk [vmem:[#allocation2] sm:$0xff] %vm1760_vm8, %v1665_v33  ;;  %1686 = vrot.lane.b32.xlu0 %v3346_v53, %s2956_s11  ;;  %1110 = vrot.lane.b32.xlu1 %v3346_v53, %s2953_s20 }
 0x135   : > { %v898_v3 = vpop.permute.xlu0 %897  ;;  %v1089_v22 = vpop.permute.xlu1 %1088 }
 0x136   : > { %991 = vst.msk [vmem:[#allocation2 + $0x18] sm:$0xff] %vm987_vm4, %v898_v3 }
 0x137   : > { %1183 = vst.msk [vmem:[#allocation2 + $0x10] sm:$0xff] %vm1180_vm5, %v1089_v22  ;;  %1302 = vrot.lane.b32.xlu0 %v3187_v34, %s2954_s30  ;;  %726 = vrot.lane.b32.xlu1 %v3187_v34, %s2951_s4  ;;  %v2616_v34 = vld [vmem:[%s3034_s28 + $0xc9] sm:$0xff] }
 0x138   : > { %v2653_v22 = vld [vmem:[%s3034_s28 + $0x10a] sm:$0xff] }
 0x139   : > { %v1667_v52 = vpop.permute.xlu0 %1666  ;;  %v1091_v23 = vpop.permute.xlu1 %1090 }
 0x13a   : > { %v1793_v6 = vld [vmem:[#allocation2] sm:$0xff]  ;;  %1762 = vst.msk [vmem:[#allocation2 + $0x8] sm:$0xff] %vm1760_vm8, %v1667_v52 }
 0x13b   : > { %1184 = vst.msk [vmem:[#allocation2 + $0x18] sm:$0xff] %vm1180_vm5, %v1091_v23  ;;  %2763 = vmatprep.mubr.msk.f32.mxu0 %vm1834_vm9, %v1793_v6  ;;  %1304 = vrot.lane.b32.xlu0 %v3190_v35, %s2954_s30 }
 0x13c   : > { %1495 = vrot.lane.b32.xlu1 %v2615_v21, %s2955_s10 }
 0x13d   : > { %v1283_v53 = vpop.permute.xlu0 %1282  ;;  %v1285_v17 = vpop.permute.xlu1 %1284 }
 0x13e   : > { %1377 = vst.msk [vmem:[#allocation2 + $0x10] sm:$0xff] %vm1374_vm6, %v1283_v53  ;;  %1378 = vst.msk [vmem:[#allocation2 + $0x18] sm:$0xff] %vm1374_vm6, %v1285_v17 }
 0x13f   : > { %728 = vrot.lane.b32.xlu0 %v3190_v35, %s2951_s4 }
 0x140   : > { %919 = vrot.lane.b32.xlu1 %v2615_v21, %s2952_s9 }
 0x141   : > { %v1476_v62 = vpop.permute.xlu0 %1475  ;;  %v900_v63 = vpop.permute.xlu1 %899  ;;  %v1794_v7 = vld [vmem:[#allocation2 + $0x8] sm:$0xff] }
 0x142   : > { %1570 = vst.msk [vmem:[#allocation2 + $0x10] sm:$0xff] %vm1567_vm7, %v1476_v62  ;;  %2764 = vmatmul.mubr.msk.f32.vlgmr.msra.gmra.mrb[0].mxu0 %vm1834_vm9, %v1794_v7 }
 0x143   : > { %992 = vst.msk [vmem:[#allocation2 + $0x20] sm:$0xff] %vm987_vm4, %v900_v63  ;;  %1497 = vrot.lane.b32.xlu0 %v2616_v34, %s2955_s10 }
 0x144   : > { %1688 = vrot.lane.b32.xlu1 %v3353_v54, %s2956_s11 }
 0x145   : > { %v1478_v42 = vpop.permute.xlu0 %1477  ;;  %v1669_v43 = vpop.permute.xlu1 %1668 }
 0x146   : > { %1571 = vst.msk [vmem:[#allocation2 + $0x18] sm:$0xff] %vm1567_vm7, %v1478_v42  ;;  %v2623_v42 = vld [vmem:[%s3034_s28 + $0x121] sm:$0xff] }
 0x147   : > { %1763 = vst.msk [vmem:[#allocation2 + $0x10] sm:$0xff] %vm1760_vm8, %v1669_v43  ;;  %921 = vrot.lane.b32.xlu0 %v2616_v34, %s2952_s9 }
 0x148   : > { %1112 = vrot.lane.b32.xlu1 %v3353_v54, %s2953_s20  ;;  %v2617_v54 = vld [vmem:[%s3034_s28 + $0xd9] sm:$0xff] }
 0x149   : > { %v902_v35 = vpop.permute.xlu0 %901  ;;  %v1093_v12 = vpop.permute.xlu1 %1092 }
 0x14a   : > { %993 = vst.msk [vmem:[#allocation2 + $0x28] sm:$0xff] %vm987_vm4, %v902_v35 }
 0x14b   : > { %1185 = vst.msk [vmem:[#allocation2 + $0x20] sm:$0xff] %vm1180_vm5, %v1093_v12  ;;  %1690 = vrot.lane.b32.xlu0 %v3356_v55, %s2956_s11  ;;  %v2498_v12 = vld [vmem:[%s3034_s28 + $0x128] sm:$0xff] }
 0x14c   : > { %1114 = vrot.lane.b32.xlu1 %v3356_v55, %s2953_s20 }
 0x14d   : > { %v1671_v24 = vpop.permute.xlu0 %1670  ;;  %v1095_v25 = vpop.permute.xlu1 %1094 }
 0x14e   : > { %v1795_v8 = vld [vmem:[#allocation2 + $0x10] sm:$0xff]  ;;  %1764 = vst.msk [vmem:[#allocation2 + $0x18] sm:$0xff] %vm1760_vm8, %v1671_v24 }
 0x14f   : > { %1186 = vst.msk [vmem:[#allocation2 + $0x28] sm:$0xff] %vm1180_vm5, %v1095_v25  ;;  %2766 = vmatprep.mubr.msk.f32.mxu0 %vm1834_vm9, %v1795_v8  ;;  %1306 = vrot.lane.b32.xlu0 %v3197_v36, %s2954_s30  ;;  %v2655_v8 = vld [vmem:[%s3034_s28 + $0x122] sm:$0xff] }
 0x150   : > { %730 = vrot.lane.b32.xlu1 %v3197_v36, %s2951_s4  ;;  %v2618_v36 = vld [vmem:[%s3034_s28 + $0xe1] sm:$0xff] }
 0x151   : > { %v1287_v16 = vpop.permute.xlu0 %1286  ;;  %v1289_v55 = vpop.permute.xlu1 %1288 }
 0x152   : > { %1379 = vst.msk [vmem:[#allocation2 + $0x20] sm:$0xff] %vm1374_vm6, %v1287_v16  ;;  %1380 = vst.msk [vmem:[#allocation2 + $0x28] sm:$0xff] %vm1374_vm6, %v1289_v55 }
 0x153   : > { %1308 = vrot.lane.b32.xlu0 %v3200_v37, %s2954_s30 }
 0x154   : > { %1499 = vrot.lane.b32.xlu1 %v2617_v54, %s2955_s10 }
 0x155   : > { %v1480_v56 = vpop.permute.xlu0 %1479  ;;  %v904_v57 = vpop.permute.xlu1 %903  ;;  %v1796_v9 = vld [vmem:[#allocation2 + $0x18] sm:$0xff] }
 0x156   : > { %1572 = vst.msk [vmem:[#allocation2 + $0x20] sm:$0xff] %vm1567_vm7, %v1480_v56  ;;  %2767 = vmatmul.mubr.msk.f32.gmra.mrb[2].mxu0 %vm1834_vm9, %v1796_v9 }
 0x157   : > { %994 = vst.msk [vmem:[#allocation2 + $0x30] sm:$0xff] %vm987_vm4, %v904_v57  ;;  %732 = vrot.lane.b32.xlu0 %v3200_v37, %s2951_s4  ;;  %v2650_v37 = vld [vmem:[%s3034_s28 + $0xe2] sm:$0xff]  ;;  %v2656_v57 = vld [vmem:[%s3034_s28 + $0x12a] sm:$0xff] }
 0x158   : > { %923 = vrot.lane.b32.xlu1 %v2617_v54, %s2952_s9 }
 0x159   : > { %v1482_v47 = vpop.permute.xlu0 %1481  ;;  %v1673_v0 = vpop.permute.xlu1 %1672 }
 0x15a   : > { %1573 = vst.msk [vmem:[#allocation2 + $0x28] sm:$0xff] %vm1567_vm7, %v1482_v47 }
 0x15b   : > { %1765 = vst.msk [vmem:[#allocation2 + $0x20] sm:$0xff] %vm1760_vm8, %v1673_v0  ;;  %1501 = vrot.lane.b32.xlu0 %v2618_v36, %s2955_s10 }
 0x15c   : > { %1692 = vrot.lane.b32.xlu1 %v2649_v46, %s2956_s11 }
 0x15d   : > { %v906_v26 = vpop.permute.xlu0 %905  ;;  %v1097_v27 = vpop.permute.xlu1 %1096 }
 0x15e   : > { %995 = vst.msk [vmem:[#allocation2 + $0x38] sm:$0xff] %vm987_vm4, %v906_v26 }
 0x15f   : > { %1187 = vst.msk [vmem:[#allocation2 + $0x30] sm:$0xff] %vm1180_vm5, %v1097_v27  ;;  %925 = vrot.lane.b32.xlu0 %v2618_v36, %s2952_s9  ;;  %v2594_v27 = vld [vmem:[%s3034_s28 + $0x140] sm:$0xff] }
 0x160   : > { %1116 = vrot.lane.b32.xlu1 %v2649_v46, %s2953_s20  ;;  %v2593_v46 = vld [vmem:[%s3034_s28 + $0x138] sm:$0xff] }
 0x161   : > { %v1675_v10 = vpop.permute.xlu0 %1674  ;;  %v1099_v19 = vpop.permute.xlu1 %1098 }
 0x162   : > { %v1797_v20 = vld [vmem:[#allocation2 + $0x20] sm:$0xff]  ;;  %1766 = vst.msk [vmem:[#allocation2 + $0x28] sm:$0xff] %vm1760_vm8, %v1675_v10 }
 0x163   : > { %1188 = vst.msk [vmem:[#allocation2 + $0x38] sm:$0xff] %vm1180_vm5, %v1099_v19  ;;  %2769 = vmatprep.mubr.msk.f32.mxu0 %vm1834_vm9, %v1797_v20  ;;  %1694 = vrot.lane.b32.xlu0 %v2650_v37, %s2956_s11 }
 0x164   : > { %1118 = vrot.lane.b32.xlu1 %v2650_v37, %s2953_s20  ;;  %v2625_v37 = vld [vmem:[%s3034_s28 + $0x139] sm:$0xff] }
 0x165   : > { %v1291_v2 = vpop.permute.xlu0 %1290  ;;  %v1293_v11 = vpop.permute.xlu1 %1292 }
 0x166   : > { %1381 = vst.msk [vmem:[#allocation2 + $0x30] sm:$0xff] %vm1374_vm6, %v1291_v2  ;;  %1382 = vst.msk [vmem:[#allocation2 + $0x38] sm:$0xff] %vm1374_vm6, %v1293_v11  ;;  %v2626_v11 = vld [vmem:[%s3034_s28 + $0x141] sm:$0xff] }
 0x167   : > { %1310 = vrot.lane.b32.xlu0 %v3203_v38, %s2954_s30 }
 0x168   : > { %734 = vrot.lane.b32.xlu1 %v3203_v38, %s2951_s4  ;;  %v2620_v38 = vld [vmem:[%s3034_s28 + $0xf9] sm:$0xff] }
 0x169   : > { %v1484_v49 = vpop.permute.xlu0 %1483  ;;  %v908_v4 = vpop.permute.xlu1 %907  ;;  %v1798_v28 = vld [vmem:[#allocation2 + $0x28] sm:$0xff] }
 0x16a   : > { %1574 = vst.msk [vmem:[#allocation2 + $0x30] sm:$0xff] %vm1567_vm7, %v1484_v49  ;;  %2770 = vmatmul.mubr.msk.f32.gmra.mrb[4].mxu0 %vm1834_vm9, %v1798_v28 }
 0x16b   : > { %996 = vst.msk [vmem:[#allocation2 + $0x40] sm:$0xff] %vm987_vm4, %v908_v4  ;;  %1312 = vrot.lane.b32.xlu0 %v3212_v39, %s2954_s30 }
 0x16c   : > { %1503 = vrot.lane.b32.xlu1 %v2619_v48, %s2955_s10 }
 0x16d   : > { %v1486_v58 = vpop.permute.xlu0 %1485  ;;  %v1677_v59 = vpop.permute.xlu1 %1676 }
 0x16e   : > { %1575 = vst.msk [vmem:[#allocation2 + $0x38] sm:$0xff] %vm1567_vm7, %v1486_v58 }
 0x16f   : > { %1767 = vst.msk [vmem:[#allocation2 + $0x30] sm:$0xff] %vm1760_vm8, %v1677_v59  ;;  %736 = vrot.lane.b32.xlu0 %v3212_v39, %s2951_s4  ;;  %v2652_v39 = vld [vmem:[%s3034_s28 + $0xfa] sm:$0xff] }
 0x170   : > { %927 = vrot.lane.b32.xlu1 %v2619_v48, %s2952_s9  ;;  %v2657_v48 = vld [vmem:[%s3034_s28 + $0x13a] sm:$0xff] }
 0x171   : > { %v910_v14 = vpop.permute.xlu0 %909  ;;  %v1101_v31 = vpop.permute.xlu1 %1100 }
 0x172   : > { %997 = vst.msk [vmem:[#allocation2 + $0x48] sm:$0xff] %vm987_vm4, %v910_v14 }
 0x173   : > { %1189 = vst.msk [vmem:[#allocation2 + $0x40] sm:$0xff] %vm1180_vm5, %v1101_v31  ;;  %1505 = vrot.lane.b32.xlu0 %v2620_v38, %s2955_s10  ;;  %v2595_v31 = vld [vmem:[%s3034_s28 + $0x150] sm:$0xff] }
 0x174   : > { %1696 = vrot.lane.b32.xlu1 %v2651_v60, %s2956_s11 }
 0x175   : > { %v1679_v61 = vpop.permute.xlu0 %1678  ;;  %v1103_v13 = vpop.permute.xlu1 %1102 }
 0x176   : > { %v1799_v15 = vld [vmem:[#allocation2 + $0x30] sm:$0xff]  ;;  %1768 = vst.msk [vmem:[#allocation2 + $0x38] sm:$0xff] %vm1760_vm8, %v1679_v61 }
 0x177   : > { %1190 = vst.msk [vmem:[#allocation2 + $0x48] sm:$0xff] %vm1180_vm5, %v1103_v13  ;;  %2772 = vmatprep.mubr.msk.f32.mxu0 %vm1834_vm9, %v1799_v15  ;;  %929 = vrot.lane.b32.xlu0 %v2620_v38, %s2952_s9  ;;  %v2658_v38 = vld [vmem:[%s3034_s28 + $0x142] sm:$0xff] }
 0x178   : > { %1120 = vrot.lane.b32.xlu1 %v2651_v60, %s2953_s20 }
 0x179   : > { %v1295_v50 = vpop.permute.xlu0 %1294  ;;  %v719_v51 = vpop.permute.xlu1 %718 }
 0x17a   : > { %1383 = vst.msk [vmem:[#allocation2 + $0x40] sm:$0xff] %vm1374_vm6, %v1295_v50  ;;  %v2627_v50 = vld [vmem:[%s3034_s28 + $0x151] sm:$0xff] }
 0x17b   : > { %805 = vst.msk [vmem:[#allocation2 + $0x50] sm:$0xff] %vm794_vm3, %v719_v51  ;;  %1698 = vrot.lane.b32.xlu0 %v2652_v39, %s2956_s11 }
 0x17c   : > { %1122 = vrot.lane.b32.xlu1 %v2652_v39, %s2953_s20  ;;  %v2596_v39 = vld [vmem:[%s3034_s28 + $0x158] sm:$0xff] }
 0x17d   : > { %v1297_v1 = vpop.permute.xlu0 %1296  ;;  %v1488_v32 = vpop.permute.xlu1 %1487  ;;  %v1800_v5 = vld [vmem:[#allocation2 + $0x38] sm:$0xff] }
 0x17e   : > { %1384 = vst.msk [vmem:[#allocation2 + $0x48] sm:$0xff] %vm1374_vm6, %v1297_v1  ;;  %2773 = vmatmul.mubr.msk.f32.gmra.mrb[6].mxu0 %vm1834_vm9, %v1800_v5 }
 0x17f   : > { %1576 = vst.msk [vmem:[#allocation2 + $0x40] sm:$0xff] %vm1567_vm7, %v1488_v32  ;;  %1314 = vrot.lane.b32.xlu0 %v3215_v40, %s2954_s30 }
 0x180   : > { %738 = vrot.lane.b32.xlu1 %v3215_v40, %s2951_s4  ;;  %v2622_v40 = vld [vmem:[%s3034_s28 + $0x111] sm:$0xff] }
 0x181   : > { %v721_v30 = vpop.permute.xlu0 %720  ;;  %v912_v18 = vpop.permute.xlu1 %911 }
 0x182   : > { %806 = vst.msk [vmem:[#allocation2 + $0x58] sm:$0xff] %vm794_vm3, %v721_v30  ;;  %v2659_v30 = vld [vmem:[%s3034_s28 + $0x152] sm:$0xff] }
 0x183   : > { %998 = vst.msk [vmem:[#allocation2 + $0x50] sm:$0xff] %vm987_vm4, %v912_v18  ;;  %1316 = vrot.lane.b32.xlu0 %v3218_v41, %s2954_s30 }
 0x184   : > { %1507 = vrot.lane.b32.xlu1 %v2621_v29, %s2955_s10 }
 0x185   : > { %v1490_v33 = vpop.permute.xlu0 %1489  ;;  %v1681_v3 = vpop.permute.xlu1 %1680 }
 0x186   : > { %1577 = vst.msk [vmem:[#allocation2 + $0x48] sm:$0xff] %vm1567_vm7, %v1490_v33 }
 0x187   : > { %1769 = vst.msk [vmem:[#allocation2 + $0x40] sm:$0xff] %vm1760_vm8, %v1681_v3  ;;  %740 = vrot.lane.b32.xlu0 %v3218_v41, %s2951_s4  ;;  %v2654_v41 = vld [vmem:[%s3034_s28 + $0x112] sm:$0xff] }
 0x188   : > { %931 = vrot.lane.b32.xlu1 %v2621_v29, %s2952_s9  ;;  %v2628_v29 = vld [vmem:[%s3034_s28 + $0x159] sm:$0xff] }
 0x189   : > { %v914_v21 = vpop.permute.xlu0 %913  ;;  %v1105_v52 = vpop.permute.xlu1 %1104 }
 0x18a   : > { %999 = vst.msk [vmem:[#allocation2 + $0x58] sm:$0xff] %vm987_vm4, %v914_v21  ;;  %v2660_v21 = vld [vmem:[%s3034_s28 + $0x15a] sm:$0xff] }
 0x18b   : > { %1191 = vst.msk [vmem:[#allocation2 + $0x50] sm:$0xff] %vm1180_vm5, %v1105_v52  ;;  %1509 = vrot.lane.b32.xlu0 %v2622_v40, %s2955_s10 }
 0x18c   : > { %1700 = vrot.lane.b32.xlu1 %v2653_v22, %s2956_s11 }
 0x18d   : > { %v1683_v23 = vpop.permute.xlu0 %1682  ;;  %v1107_v6 = vpop.permute.xlu1 %1106 }
 0x18e   : > { %v1801_v53 = vld [vmem:[#allocation2 + $0x40] sm:$0xff]  ;;  %1770 = vst.msk [vmem:[#allocation2 + $0x48] sm:$0xff] %vm1760_vm8, %v1683_v23 }
 0x18f   : > { %1192 = vst.msk [vmem:[#allocation2 + $0x58] sm:$0xff] %vm1180_vm5, %v1107_v6  ;;  %2775 = vmatprep.mubr.msk.f32.mxu0 %vm1834_vm9, %v1801_v53  ;;  %933 = vrot.lane.b32.xlu0 %v2622_v40, %s2952_s9  ;;  %v2597_v6 = vld [vmem:[%s3034_s28 + $0x168] sm:$0xff] }
 0x190   : > { %1124 = vrot.lane.b32.xlu1 %v2653_v22, %s2953_s20 }
 0x191   : > { %v1299_v17 = vpop.permute.xlu0 %1298  ;;  %v723_v34 = vpop.permute.xlu1 %722 }
 0x192   : > { %1385 = vst.msk [vmem:[#allocation2 + $0x50] sm:$0xff] %vm1374_vm6, %v1299_v17 }
 0x193   : > { %807 = vst.msk [vmem:[#allocation2 + $0x60] sm:$0xff] %vm794_vm3, %v723_v34  ;;  %1702 = vrot.lane.b32.xlu0 %v2654_v41, %s2956_s11  ;;  %v2598_v34 = vld [vmem:[%s3034_s28 + $0x170] sm:$0xff] }
 0x194   : > { %1126 = vrot.lane.b32.xlu1 %v2654_v41, %s2953_s20 }
 0x195   : > { %v1301_v62 = vpop.permute.xlu0 %1300  ;;  %v1492_v63 = vpop.permute.xlu1 %1491  ;;  %v1802_v7 = vld [vmem:[#allocation2 + $0x48] sm:$0xff] }
 0x196   : > { %1386 = vst.msk [vmem:[#allocation2 + $0x58] sm:$0xff] %vm1374_vm6, %v1301_v62  ;;  %2776 = vmatmul.mubr.msk.f32.gmra.mrb[8].mxu0 %vm1834_vm9, %v1802_v7  ;;  %v2629_v62 = vld [vmem:[%s3034_s28 + $0x169] sm:$0xff] }
 0x197   : > { %1578 = vst.msk [vmem:[#allocation2 + $0x50] sm:$0xff] %vm1567_vm7, %v1492_v63  ;;  %1318 = vrot.lane.b32.xlu0 %v3231_v44, %s2954_s30 }
 0x198   : > { %742 = vrot.lane.b32.xlu1 %v3231_v44, %s2951_s4  ;;  %v2624_v44 = vld [vmem:[%s3034_s28 + $0x129] sm:$0xff] }
 0x199   : > { %v725_v43 = vpop.permute.xlu0 %724  ;;  %v916_v35 = vpop.permute.xlu1 %915 }
 0x19a   : > { %808 = vst.msk [vmem:[#allocation2 + $0x68] sm:$0xff] %vm794_vm3, %v725_v43 }
 0x19b   : > { %1000 = vst.msk [vmem:[#allocation2 + $0x60] sm:$0xff] %vm987_vm4, %v916_v35  ;;  %1320 = vrot.lane.b32.xlu0 %v3236_v45, %s2954_s30  ;;  %v2630_v35 = vld [vmem:[%s3034_s28 + $0x171] sm:$0xff] }
 0x19c   : > { %1511 = vrot.lane.b32.xlu1 %v2623_v42, %s2955_s10 }
 0x19d   : > { %v1494_v24 = vpop.permute.xlu0 %1493  ;;  %v1685_v25 = vpop.permute.xlu1 %1684 }
 0x19e   : > { %1579 = vst.msk [vmem:[#allocation2 + $0x58] sm:$0xff] %vm1567_vm7, %v1494_v24 }
 0x19f   : > { %1771 = vst.msk [vmem:[#allocation2 + $0x50] sm:$0xff] %vm1760_vm8, %v1685_v25  ;;  %744 = vrot.lane.b32.xlu0 %v2498_v12, %s2951_s4  ;;  %v2661_v12 = vld [vmem:[%s3034_s28 + $0x16a] sm:$0xff] }
 0x1a0   : > { %935 = vrot.lane.b32.xlu1 %v2623_v42, %s2952_s9 }
 0x1a1   : > { %v918_v54 = vpop.permute.xlu0 %917  ;;  %v1109_v16 = vpop.permute.xlu1 %1108 }
 0x1a2   : > { %1001 = vst.msk [vmem:[#allocation2 + $0x68] sm:$0xff] %vm987_vm4, %v918_v54 }
 0x1a3   : > { %1193 = vst.msk [vmem:[#allocation2 + $0x60] sm:$0xff] %vm1180_vm5, %v1109_v16  ;;  %1513 = vrot.lane.b32.xlu0 %v2624_v44, %s2955_s10  ;;  %v2662_v16 = vld [vmem:[%s3034_s28 + $0x172] sm:$0xff] }
 0x1a4   : > { %1704 = vrot.lane.b32.xlu1 %v2655_v8, %s2956_s11 }
 0x1a5   : > { %v1687_v45 = vpop.permute.xlu0 %1686  ;;  %v1111_v55 = vpop.permute.xlu1 %1110 }
 0x1a6   : > { %v1803_v56 = vld [vmem:[#allocation2 + $0x50] sm:$0xff]  ;;  %1772 = vst.msk [vmem:[#allocation2 + $0x58] sm:$0xff] %vm1760_vm8, %v1687_v45 }
 0x1a7   : > { %1194 = vst.msk [vmem:[#allocation2 + $0x68] sm:$0xff] %vm1180_vm5, %v1111_v55  ;;  %2778 = vmatprep.mubr.msk.f32.mxu0 %vm1834_vm9, %v1803_v56  ;;  %937 = vrot.lane.b32.xlu0 %v2624_v44, %s2952_s9  ;;  %v2599_v56 = vld [vmem:[%s3034_s28 + $0x180] sm:$0xff] }
 0x1a8   : > { %1128 = vrot.lane.b32.xlu1 %v2655_v8, %s2953_s20 }
 0x1a9   : > { %v1303_v9 = vpop.permute.xlu0 %1302  ;;  %v727_v36 = vpop.permute.xlu1 %726 }
 0x1aa   : > { %1387 = vst.msk [vmem:[#allocation2 + $0x60] sm:$0xff] %vm1374_vm6, %v1303_v9 }
 0x1ab   : > { %809 = vst.msk [vmem:[#allocation2 + $0x70] sm:$0xff] %vm794_vm3, %v727_v36  ;;  %1706 = vrot.lane.b32.xlu0 %v2656_v57, %s2956_s11 }
 0x1ac   : > { %1130 = vrot.lane.b32.xlu1 %v2656_v57, %s2953_s20 }
 0x1ad   : > { %v1305_v47 = vpop.permute.xlu0 %1304  ;;  %v1804_v26 = vld [vmem:[#allocation2 + $0x58] sm:$0xff] }
 0x1ae   : > { %v1496_v0 = vpop.permute.xlu1 %1495  ;;  %1388 = vst.msk [vmem:[#allocation2 + $0x68] sm:$0xff] %vm1374_vm6, %v1305_v47  ;;  %2779 = vmatmul.mubr.msk.f32.gmra.mrb[10].mxu0 %vm1834_vm9, %v1804_v26  ;;  %v2631_v47 = vld [vmem:[%s3034_s28 + $0x181] sm:$0xff] }
 0x1af   : > { %1580 = vst.msk [vmem:[#allocation2 + $0x60] sm:$0xff] %vm1567_vm7, %v1496_v0  ;;  %1322 = vrot.lane.b32.xlu0 %v2593_v46, %s2954_s30 }
 0x1b0   : > { %746 = vrot.lane.b32.xlu1 %v2593_v46, %s2951_s4  ;;  %v2600_v46 = vld [vmem:[%s3034_s28 + $0x188] sm:$0xff] }
 0x1b1   : > { %v729_v10 = vpop.permute.xlu0 %728 }
 0x1b2   : > { %v920_v19 = vpop.permute.xlu1 %919  ;;  %810 = vst.msk [vmem:[#allocation2 + $0x78] sm:$0xff] %vm794_vm3, %v729_v10  ;;  %v2632_v10 = vld [vmem:[%s3034_s28 + $0x189] sm:$0xff] }
 0x1b3   : > { %1002 = vst.msk [vmem:[#allocation2 + $0x70] sm:$0xff] %vm987_vm4, %v920_v19  ;;  %1324 = vrot.lane.b32.xlu0 %v2594_v27, %s2954_s30  ;;  %v2663_v19 = vld [vmem:[%s3034_s28 + $0x182] sm:$0xff] }
 0x1b4   : > { %1515 = vrot.lane.b32.xlu1 %v2625_v37, %s2955_s10 }
 0x1b5   : > { %v1498_v20 = vpop.permute.xlu0 %1497 }
 0x1b6   : > { %v1689_v2 = vpop.permute.xlu1 %1688  ;;  %1581 = vst.msk [vmem:[#allocation2 + $0x68] sm:$0xff] %vm1567_vm7, %v1498_v20 }
 0x1b7   : > { %1773 = vst.msk [vmem:[#allocation2 + $0x60] sm:$0xff] %vm1760_vm8, %v1689_v2  ;;  %748 = vrot.lane.b32.xlu0 %v2594_v27, %s2951_s4 }
 0x1b8   : > { %939 = vrot.lane.b32.xlu1 %v2625_v37, %s2952_s9 }
 0x1b9   : > { %v922_v49 = vpop.permute.xlu0 %921 }
 0x1ba   : > { %v1113_v4 = vpop.permute.xlu1 %1112  ;;  %1003 = vst.msk [vmem:[#allocation2 + $0x78] sm:$0xff] %vm987_vm4, %v922_v49 }
 0x1bb   : > { %1195 = vst.msk [vmem:[#allocation2 + $0x70] sm:$0xff] %vm1180_vm5, %v1113_v4  ;;  %1517 = vrot.lane.b32.xlu0 %v2626_v11, %s2955_s10  ;;  %v2664_v4 = vld [vmem:[%s3034_s28 + $0x18a] sm:$0xff] }
 0x1bc   : > { %1708 = vrot.lane.b32.xlu1 %v2657_v48, %s2956_s11 }
 0x1bd   : > { %v1691_v28 = vpop.permute.xlu0 %1690 }
 0x1be   : > { %v1115_v58 = vpop.permute.xlu1 %1114  ;;  %v1805_v59 = vld [vmem:[#allocation2 + $0x60] sm:$0xff]  ;;  %1774 = vst.msk [vmem:[#allocation2 + $0x68] sm:$0xff] %vm1760_vm8, %v1691_v28 }
 0x1bf   : > { %1196 = vst.msk [vmem:[#allocation2 + $0x78] sm:$0xff] %vm1180_vm5, %v1115_v58  ;;  %2781 = vmatprep.mubr.msk.f32.mxu0 %vm1834_vm9, %v1805_v59  ;;  %941 = vrot.lane.b32.xlu0 %v2626_v11, %s2952_s9  ;;  %v2601_v59 = vld [vmem:[%s3034_s28 + $0x198] sm:$0xff] }
 0x1c0   : > { %1132 = vrot.lane.b32.xlu1 %v2657_v48, %s2953_s20 }
 0x1c1   : > { %v1307_v60 = vpop.permute.xlu0 %1306 }
 0x1c2   : > { %v731_v14 = vpop.permute.xlu1 %730  ;;  %1389 = vst.msk [vmem:[#allocation2 + $0x70] sm:$0xff] %vm1374_vm6, %v1307_v60 }
 0x1c3   : > { %811 = vst.msk [vmem:[#allocation2 + $0x80] sm:$0xff] %vm794_vm3, %v731_v14  ;;  %1710 = vrot.lane.b32.xlu0 %v2658_v38, %s2956_s11 }
 0x1c4   : > { %1134 = vrot.lane.b32.xlu1 %v2658_v38, %s2953_s20  ;;  %v2602_v38 = vld [vmem:[%s3034_s28 + $0x1a0] sm:$0xff] }
 0x1c5   : > { %v1309_v61 = vpop.permute.xlu0 %1308  ;;  %v1806_v15 = vld [vmem:[#allocation2 + $0x68] sm:$0xff] }
 0x1c6   : > { %v1500_v13 = vpop.permute.xlu1 %1499  ;;  %1390 = vst.msk [vmem:[#allocation2 + $0x78] sm:$0xff] %vm1374_vm6, %v1309_v61  ;;  %2782 = vmatmul.mubr.msk.f32.gmra.mrb[12].mxu0 %vm1834_vm9, %v1806_v15  ;;  %v2633_v61 = vld [vmem:[%s3034_s28 + $0x199] sm:$0xff] }
 0x1c7   : > { %1582 = vst.msk [vmem:[#allocation2 + $0x70] sm:$0xff] %vm1567_vm7, %v1500_v13  ;;  %1326 = vrot.lane.b32.xlu0 %v2595_v31, %s2954_s30  ;;  %v2634_v13 = vld [vmem:[%s3034_s28 + $0x1a1] sm:$0xff] }
 0x1c8   : > { %750 = vrot.lane.b32.xlu1 %v2595_v31, %s2951_s4 }
 0x1c9   : > { %v733_v51 = vpop.permute.xlu0 %732 }
 0x1ca   : > { %v924_v1 = vpop.permute.xlu1 %923  ;;  %812 = vst.msk [vmem:[#allocation2 + $0x88] sm:$0xff] %vm794_vm3, %v733_v51  ;;  %v2666_v51 = vld [vmem:[%s3034_s28 + $0x1a2] sm:$0xff] }
 0x1cb   : > { %1004 = vst.msk [vmem:[#allocation2 + $0x80] sm:$0xff] %vm987_vm4, %v924_v1  ;;  %1328 = vrot.lane.b32.xlu0 %v2596_v39, %s2954_s30 }
 0x1cc   : > { %1519 = vrot.lane.b32.xlu1 %v2627_v50, %s2955_s10 }
 0x1cd   : > { %v1502_v32 = vpop.permute.xlu0 %1501 }
 0x1ce   : > { %v1693_v5 = vpop.permute.xlu1 %1692  ;;  %1583 = vst.msk [vmem:[#allocation2 + $0x78] sm:$0xff] %vm1567_vm7, %v1502_v32 }
 0x1cf   : > { %1775 = vst.msk [vmem:[#allocation2 + $0x70] sm:$0xff] %vm1760_vm8, %v1693_v5  ;;  %752 = vrot.lane.b32.xlu0 %v2596_v39, %s2951_s4 }
 0x1d0   : > { %943 = vrot.lane.b32.xlu1 %v2627_v50, %s2952_s9  ;;  %v2665_v50 = vld [vmem:[%s3034_s28 + $0x19a] sm:$0xff] }
 0x1d1   : > { %v926_v18 = vpop.permute.xlu0 %925 }
 0x1d2   : > { %v1117_v33 = vpop.permute.xlu1 %1116  ;;  %1005 = vst.msk [vmem:[#allocation2 + $0x88] sm:$0xff] %vm987_vm4, %v926_v18 }
 0x1d3   : > { %1197 = vst.msk [vmem:[#allocation2 + $0x80] sm:$0xff] %vm1180_vm5, %v1117_v33  ;;  %1521 = vrot.lane.b32.xlu0 %v2628_v29, %s2955_s10 }
 0x1d4   : > { %1712 = vrot.lane.b32.xlu1 %v2659_v30, %s2956_s11 }
 0x1d5   : > { %v1695_v3 = vpop.permute.xlu0 %1694 }
 0x1d6   : > { %v1119_v40 = vpop.permute.xlu1 %1118  ;;  %v1807_v22 = vld [vmem:[#allocation2 + $0x70] sm:$0xff]  ;;  %1776 = vst.msk [vmem:[#allocation2 + $0x78] sm:$0xff] %vm1760_vm8, %v1695_v3 }
 0x1d7   : > { %1198 = vst.msk [vmem:[#allocation2 + $0x88] sm:$0xff] %vm1180_vm5, %v1119_v40  ;;  %2784 = vmatprep.mubr.msk.f32.mxu0 %vm1834_vm9, %v1807_v22  ;;  %945 = vrot.lane.b32.xlu0 %v2628_v29, %s2952_s9 }
 0x1d8   : > { %1136 = vrot.lane.b32.xlu1 %v2659_v30, %s2953_s20 }
 0x1d9   : > { %v1311_v52 = vpop.permute.xlu0 %1310 }
 0x1da   : > { %v735_v23 = vpop.permute.xlu1 %734  ;;  %1391 = vst.msk [vmem:[#allocation2 + $0x80] sm:$0xff] %vm1374_vm6, %v1311_v52 }
 0x1db   : > { %813 = vst.msk [vmem:[#allocation2 + $0x90] sm:$0xff] %vm794_vm3, %v735_v23  ;;  %1714 = vrot.lane.b32.xlu0 %v2660_v21, %s2956_s11 }
 0x1dc   : > { %1138 = vrot.lane.b32.xlu1 %v2660_v21, %s2953_s20 }
 0x1dd   : > { %v1313_v53 = vpop.permute.xlu0 %1312  ;;  %v1808_v17 = vld [vmem:[#allocation2 + $0x78] sm:$0xff] }
 0x1de   : > { %v1504_v41 = vpop.permute.xlu1 %1503  ;;  %1392 = vst.msk [vmem:[#allocation2 + $0x88] sm:$0xff] %vm1374_vm6, %v1313_v53  ;;  %2785 = vmatmul.mubr.msk.f32.gmra.mrb[14].mxu0 %vm1834_vm9, %v1808_v17 }
 0x1df   : > { %1584 = vst.msk [vmem:[#allocation2 + $0x80] sm:$0xff] %vm1567_vm7, %v1504_v41  ;;  %1330 = vrot.lane.b32.xlu0 %v2597_v6, %s2954_s30 }
 0x1e0   : > { %754 = vrot.lane.b32.xlu1 %v2597_v6, %s2951_s4 }
 0x1e1   : > { %v737_v63 = vpop.permute.xlu0 %736 }
 0x1e2   : > { %v928_v7 = vpop.permute.xlu1 %927  ;;  %814 = vst.msk [vmem:[#allocation2 + $0x98] sm:$0xff] %vm794_vm3, %v737_v63 }
 0x1e3   : > { %1006 = vst.msk [vmem:[#allocation2 + $0x90] sm:$0xff] %vm987_vm4, %v928_v7  ;;  %1332 = vrot.lane.b32.xlu0 %v2598_v34, %s2954_s30 }
 0x1e4   : > { %1523 = vrot.lane.b32.xlu1 %v2629_v62, %s2955_s10 }
 0x1e5   : > { %v1506_v42 = vpop.permute.xlu0 %1505 }
 0x1e6   : > { %v1697_v43 = vpop.permute.xlu1 %1696  ;;  %1585 = vst.msk [vmem:[#allocation2 + $0x88] sm:$0xff] %vm1567_vm7, %v1506_v42 }
 0x1e7   : > { %1777 = vst.msk [vmem:[#allocation2 + $0x80] sm:$0xff] %vm1760_vm8, %v1697_v43  ;;  %756 = vrot.lane.b32.xlu0 %v2598_v34, %s2951_s4 }
 0x1e8   : > { %947 = vrot.lane.b32.xlu1 %v2629_v62, %s2952_s9 }
 0x1e9   : > { %v930_v24 = vpop.permute.xlu0 %929 }
 0x1ea   : > { %v1121_v25 = vpop.permute.xlu1 %1120  ;;  %1007 = vst.msk [vmem:[#allocation2 + $0x98] sm:$0xff] %vm987_vm4, %v930_v24 }
 0x1eb   : > { %1199 = vst.msk [vmem:[#allocation2 + $0x90] sm:$0xff] %vm1180_vm5, %v1121_v25  ;;  %1525 = vrot.lane.b32.xlu0 %v2630_v35, %s2955_s10 }
 0x1ec   : > { %1716 = vrot.lane.b32.xlu1 %v2661_v12, %s2956_s11 }
 0x1ed   : > { %v1699_v44 = vpop.permute.xlu0 %1698 }
 0x1ee   : > { %v1123_v8 = vpop.permute.xlu1 %1122  ;;  %v1809_v54 = vld [vmem:[#allocation2 + $0x80] sm:$0xff]  ;;  %1778 = vst.msk [vmem:[#allocation2 + $0x88] sm:$0xff] %vm1760_vm8, %v1699_v44 }
 0x1ef   : > { %1200 = vst.msk [vmem:[#allocation2 + $0x98] sm:$0xff] %vm1180_vm5, %v1123_v8  ;;  %2787 = vmatprep.mubr.msk.f32.mxu1 %vm1834_vm9, %v1809_v54  ;;  %949 = vrot.lane.b32.xlu0 %v2630_v35, %s2952_s9 }
 0x1f0   : > { %1140 = vrot.lane.b32.xlu1 %v2661_v12, %s2953_s20 }
 0x1f1   : > { %v1315_v45 = vpop.permute.xlu0 %1314 }
 0x1f2   : > { %v739_v55 = vpop.permute.xlu1 %738  ;;  %1393 = vst.msk [vmem:[#allocation2 + $0x90] sm:$0xff] %vm1374_vm6, %v1315_v45 }
 0x1f3   : > { %815 = vst.msk [vmem:[#allocation2 + $0xa0] sm:$0xff] %vm794_vm3, %v739_v55  ;;  %1718 = vrot.lane.b32.xlu0 %v2662_v16, %s2956_s11 }
 0x1f4   : > { %1142 = vrot.lane.b32.xlu1 %v2662_v16, %s2953_s20 }
 0x1f5   : > { %v1317_v57 = vpop.permute.xlu0 %1316  ;;  %v1810_v36 = vld [vmem:[#allocation2 + $0x88] sm:$0xff] }
 0x1f6   : > { %v1508_v9 = vpop.permute.xlu1 %1507  ;;  %1394 = vst.msk [vmem:[#allocation2 + $0x98] sm:$0xff] %vm1374_vm6, %v1317_v57  ;;  %2788 = vmatmul.mubr.msk.f32.vlgmr.msra.gmra.mrb[0].mxu1 %vm1834_vm9, %v1810_v36 }
 0x1f7   : > { %1586 = vst.msk [vmem:[#allocation2 + $0x90] sm:$0xff] %vm1567_vm7, %v1508_v9  ;;  %1334 = vrot.lane.b32.xlu0 %v2599_v56, %s2954_s30 }
 0x1f8   : > { %758 = vrot.lane.b32.xlu1 %v2599_v56, %s2951_s4 }
 0x1f9   : > { %v741_v0 = vpop.permute.xlu0 %740 }
 0x1fa   : > { %v932_v26 = vpop.permute.xlu1 %931  ;;  %816 = vst.msk [vmem:[#allocation2 + $0xa8] sm:$0xff] %vm794_vm3, %v741_v0 }
 0x1fb   : > { %1008 = vst.msk [vmem:[#allocation2 + $0xa0] sm:$0xff] %vm987_vm4, %v932_v26  ;;  %1336 = vrot.lane.b32.xlu0 %v2600_v46, %s2954_s30 }
 0x1fc   : > { %1527 = vrot.lane.b32.xlu1 %v2631_v47, %s2955_s10 }
 0x1fd   : > { %v1510_v27 = vpop.permute.xlu0 %1509 }
 0x1fe   : > { %v1701_v37 = vpop.permute.xlu1 %1700  ;;  %1587 = vst.msk [vmem:[#allocation2 + $0x98] sm:$0xff] %vm1567_vm7, %v1510_v27 }
 0x1ff   : > { %1779 = vst.msk [vmem:[#allocation2 + $0x90] sm:$0xff] %vm1760_vm8, %v1701_v37  ;;  %760 = vrot.lane.b32.xlu0 %v2600_v46, %s2951_s4  ;;  %s2703_s4 = sshll.u32 %s3028_s24, 8  ;;  %s169_s24 = sand.u32 1, %s2939_s13  }
 0x200   : > { %951 = vrot.lane.b32.xlu1 %v2631_v47, %s2952_s9  ;;  %s3975_s25 = scalar_lea.vmem %s4230_s2, %s2703_s4  ;;  %s2471_s28 = sshll.u32 %s169_s24, 1 }
 0x201   : > { %v934_v20 = vpop.permute.xlu0 %933  ;;  %s171_s27 = scalar_lea.vmem [#allocation3], %s2471_s28  ;;  %s2367_s7 = scalar_lea.sflag [#allocation4], %s169_s24 }
 0x202   : > { %v1125_v2 = vpop.permute.xlu1 %1124  ;;  %1009 = vst.msk [vmem:[#allocation2 + $0xa8] sm:$0xff] %vm987_vm4, %v934_v20  ;;  %s2383_s29 = sshll.u32 %s171_s27, 4  ;;  %s4188_s29 = int_to_ptr.vmem [resolvable:$true] %s2383_s29 }
 0x203   : > { %1201 = vst.msk [vmem:[#allocation2 + $0xa0] sm:$0xff] %vm1180_vm5, %v1125_v2  ;;  %1529 = vrot.lane.b32.xlu0 %v2632_v10, %s2955_s10  ;;  %s2885_s8 = scalar_lea.vmem %s4188_s29, 32 }
 0x204   : > { %1720 = vrot.lane.b32.xlu1 %v2663_v19, %s2956_s11  ;;  %p2886_p11 = scmp.ne.s32.totalorder %s4188_s29, %s2885_s8 }
 0x205   : > { %v1703_v11 = vpop.permute.xlu0 %1702 }
 0x206   : > { %v1127_v48 = vpop.permute.xlu1 %1126  ;;  %v1811_v49 = vld [vmem:[#allocation2 + $0x90] sm:$0xff]  ;;  %1780 = vst.msk [vmem:[#allocation2 + $0x98] sm:$0xff] %vm1760_vm8, %v1703_v11  ;;  %p2887_p12 = pnand %p2886_p11, %p3016_p5 }
 0x207   : > { %1202 = vst.msk [vmem:[#allocation2 + $0xa8] sm:$0xff] %vm1180_vm5, %v1127_v48  ;;  %2790 = vmatprep.mubr.msk.f32.mxu1 %vm1834_vm9, %v1811_v49  ;;  %953 = vrot.lane.b32.xlu0 %v2632_v10, %s2952_s9 }
 0x208   : > { %1144 = vrot.lane.b32.xlu1 %v2663_v19, %s2953_s20  ;;  %p2888_p13 = pneg %p2887_p12 }
 0x209   : > { %v1319_v28 = vpop.permute.xlu0 %1318 }
 0x20a   : > { %v743_v58 = vpop.permute.xlu1 %742  ;;  %1395 = vst.msk [vmem:[#allocation2 + $0xa0] sm:$0xff] %vm1374_vm6, %v1319_v28 }
 0x20b   : > { %817 = vst.msk [vmem:[#allocation2 + $0xb0] sm:$0xff] %vm794_vm3, %v743_v58  ;;  %1722 = vrot.lane.b32.xlu0 %v2664_v4, %s2956_s11 }
 0x20c   : > { %1146 = vrot.lane.b32.xlu1 %v2664_v4, %s2953_s20 }
 0x20d   : > { %v1321_v60 = vpop.permute.xlu0 %1320  ;;  %v1812_v31 = vld [vmem:[#allocation2 + $0x98] sm:$0xff] }
 0x20e   : > { %v1512_v14 = vpop.permute.xlu1 %1511  ;;  %1396 = vst.msk [vmem:[#allocation2 + $0xa8] sm:$0xff] %vm1374_vm6, %v1321_v60  ;;  %2791 = vmatmul.mubr.msk.f32.gmra.mrb[2].mxu1 %vm1834_vm9, %v1812_v31 }
 0x20f   : > { %1588 = vst.msk [vmem:[#allocation2 + $0xa0] sm:$0xff] %vm1567_vm7, %v1512_v14  ;;  %1338 = vrot.lane.b32.xlu0 %v2601_v59, %s2954_s30 }
 0x210   : > { %1340 = vrot.lane.b32.xlu1 %v2602_v38, %s2954_s30 }
 0x211   : > { %v745_v15 = vpop.permute.xlu0 %744 }
 0x212   : > { %v936_v39 = vpop.permute.xlu1 %935  ;;  %818 = vst.msk [vmem:[#allocation2 + $0xb8] sm:$0xff] %vm794_vm3, %v745_v15 }
 0x213   : > { %1010 = vst.msk [vmem:[#allocation2 + $0xb0] sm:$0xff] %vm987_vm4, %v936_v39  ;;  %1531 = vrot.lane.b32.xlu0 %v2633_v61, %s2955_s10 }
 0x214   : > { %1533 = vrot.lane.b32.xlu1 %v2634_v13, %s2955_s10  ;;  %s2889_s10 = sshll.u32 %s2957_s16, 4  ;;  %s2890_s10 = int_to_ptr.vmem [resolvable:$false] %s2889_s10 }
 0x215   : > { %v1514_v1 = vpop.permute.xlu0 %1513  ;;  %v2765_v32 = vpop.f32.mrb[0].mxu0  ;;  %p2892_p0 = scmp.lt.s32.totalorder %s4188_s29, %s2890_s10 }
 0x216   : > { %1589 = vst.msk [vmem:[#allocation2 + $0xa8] sm:$0xff] %vm1567_vm7, %v1514_v1  ;;  %v2189_v5 = vsel %vm214_vm0, %v2765_v32, 0.0  ;;  %v2260_v29 = vmul.f32 %v2765_v32, %v2765_v32  ;;  %v1705_v30 = vpop.permute.xlu1 %1704  ;;  %v1997_v18 = vpop.f32.mrb[1].mxu0 }
 0x217   : > { %2157 = vst.msk [vmem:[%s3975_s25 + $0x8] sm:$0xff] %vm214_vm0, %v2765_v32  ;;  %2156 = vst.msk [vmem:[%s3975_s25] sm:$0xff] %vm214_vm0, %v1997_v18  ;;  %v2188_v33 = vsel %vm214_vm0, %v1997_v18, 0.0  ;;  %v2259_v3 = vmul.f32 %v1997_v18, %v1997_v18  ;;  %1724 = vrot.lane.b32.xlu0 %v2665_v50, %s2956_s11 }
 0x218   : > { %1781 = vst.msk [vmem:[#allocation2 + $0xa0] sm:$0xff] %vm1760_vm8, %v1705_v30  ;;  %1726 = vrot.lane.b32.xlu1 %v2666_v51, %s2956_s11  ;;  %v2292_v40 = vsel %vm214_vm0, %v2260_v29, 0.0  ;;  %v2190_v22 = vadd.f32 %v2189_v5, %v2188_v33  ;;  %s2891_s11 = scalar_lea.vmem %s2890_s10, 64 }
 0x219   : > { %v2291_v21 = vsel %vm214_vm0, %v2259_v3, 0.0  ;;  %v938_v52 = vpop.permute.xlu0 %937  ;;  %p2893_p1 = scmp.lt.s32.totalorder %s2891_s11, %s2885_s8 }
 0x21a   : > { %v2293_v23 = vadd.f32 %v2292_v40, %v2291_v21  ;;  %1011 = vst.msk [vmem:[#allocation2 + $0xb8] sm:$0xff] %vm987_vm4, %v938_v52  ;;  %v1129_v6 = vpop.permute.xlu1 %1128 }
 0x21b   : > { %1203 = vst.msk [vmem:[#allocation2 + $0xb0] sm:$0xff] %vm1180_vm5, %v1129_v6  ;;  %p2894_p2 = por %p2893_p1, %p2892_p0 }
 0x21d   : > { %v1707_v53 = vpop.permute.xlu0 %1706  ;;  %p2895_p3 = pnand %p2894_p2, %p2888_p13 }
 0x21e   : > { %1782 = vst.msk [vmem:[#allocation2 + $0xa8] sm:$0xff] %vm1760_vm8, %v1707_v53  ;;  %v1131_v41 = vpop.permute.xlu1 %1130 }
 0x21f   : > { %v1813_v17 = vld [vmem:[#allocation2 + $0xa0] sm:$0xff]  ;;  %1204 = vst.msk [vmem:[#allocation2 + $0xb8] sm:$0xff] %vm1180_vm5, %v1131_v41 }
 0x220   : > { %2793 = vmatprep.mubr.msk.f32.mxu1 %vm1834_vm9, %v1813_v17 }
 0x221   : > { %v1323_v34 = vpop.permute.xlu0 %1322 }
 0x222   : > { %1397 = vst.msk [vmem:[#allocation2 + $0xb0] sm:$0xff] %vm1374_vm6, %v1323_v34  ;;  %v747_v62 = vpop.permute.xlu1 %746 }
 0x223   : > { %819 = vst.msk [vmem:[#allocation2 + $0xc0] sm:$0xff] %vm794_vm3, %v747_v62 }
 0x225   : > { %v1325_v63 = vpop.permute.xlu0 %1324  ;;  %v1814_v7 = vld [vmem:[#allocation2 + $0xa8] sm:$0xff] }
 0x226   : > { %1398 = vst.msk [vmem:[#allocation2 + $0xb8] sm:$0xff] %vm1374_vm6, %v1325_v63  ;;  %v1516_v42 = vpop.permute.xlu1 %1515  ;;  %2794 = vmatmul.mubr.msk.f32.gmra.mrb[4].mxu1 %vm1834_vm9, %v1814_v7 }
 0x227   : > { %1590 = vst.msk [vmem:[#allocation2 + $0xb0] sm:$0xff] %vm1567_vm7, %v1516_v42 }
 0x229   : > { %v749_v43 = vpop.permute.xlu0 %748  ;;  %v2768_v35 = vpop.f32.mrb[2].mxu0 }
 0x22a   : > { %820 = vst.msk [vmem:[#allocation2 + $0xc8] sm:$0xff] %vm794_vm3, %v749_v43  ;;  %v940_v12 = vpop.permute.xlu1 %939  ;;  %v2007_v24 = vpop.f32.mrb[3].mxu0  ;;  %v2262_v25 = vmul.f32 %v2768_v35, %v2768_v35  ;;  %v2193_v16 = vsel %vm214_vm0, %v2768_v35, 0.0 }
 0x22b   : > { %2159 = vst.msk [vmem:[%s3975_s25 + $0x18] sm:$0xff] %vm214_vm0, %v2768_v35  ;;  %2158 = vst.msk [vmem:[%s3975_s25 + $0x10] sm:$0xff] %vm214_vm0, %v2007_v24  ;;  %v2191_v44 = vsel %vm214_vm0, %v2007_v24, 0.0  ;;  %v2261_v8 = vmul.f32 %v2007_v24, %v2007_v24 }
 0x22c   : > { %1012 = vst.msk [vmem:[#allocation2 + $0xc0] sm:$0xff] %vm987_vm4, %v940_v12  ;;  %v2192_v54 = vadd.f32 %v2191_v44, %v2190_v22  ;;  %v2296_v36 = vsel %vm214_vm0, %v2262_v25, 0.0 }
 0x22d   : > { %v2294_v45 = vsel %vm214_vm0, %v2261_v8, 0.0  ;;  %v1518_v55 = vpop.permute.xlu0 %1517 }
 0x22e   : > { %v2295_v56 = vadd.f32 %v2294_v45, %v2293_v23  ;;  %1591 = vst.msk [vmem:[#allocation2 + $0xb8] sm:$0xff] %vm1567_vm7, %v1518_v55  ;;  %v1709_v57 = vpop.permute.xlu1 %1708  ;;  %v2194_v9 = vadd.f32 %v2193_v16, %v2192_v54 }
 0x22f   : > { %1783 = vst.msk [vmem:[#allocation2 + $0xb0] sm:$0xff] %vm1760_vm8, %v1709_v57 }
 0x230   : > { %v2297_v46 = vadd.f32 %v2296_v36, %v2295_v56 }
 0x231   : > { %v942_v47 = vpop.permute.xlu0 %941 }
 0x232   : > { %1013 = vst.msk [vmem:[#allocation2 + $0xc8] sm:$0xff] %vm987_vm4, %v942_v47  ;;  %v1133_v0 = vpop.permute.xlu1 %1132 }
 0x233   : > { %1205 = vst.msk [vmem:[#allocation2 + $0xc0] sm:$0xff] %vm1180_vm5, %v1133_v0 }
 0x235   : > { %v1711_v26 = vpop.permute.xlu0 %1710 }
 0x236   : > { %1784 = vst.msk [vmem:[#allocation2 + $0xb8] sm:$0xff] %vm1760_vm8, %v1711_v26  ;;  %v1135_v27 = vpop.permute.xlu1 %1134  ;;  %v1815_v37 = vld [vmem:[#allocation2 + $0xb0] sm:$0xff] }
 0x237   : > { %1206 = vst.msk [vmem:[#allocation2 + $0xc8] sm:$0xff] %vm1180_vm5, %v1135_v27  ;;  %2796 = vmatprep.mubr.msk.f32.mxu1 %vm1834_vm9, %v1815_v37 }
 0x239   : > { %v1327_v10 = vpop.permute.xlu0 %1326 }
 0x23a   : > { %1399 = vst.msk [vmem:[#allocation2 + $0xc0] sm:$0xff] %vm1374_vm6, %v1327_v10  ;;  %v751_v19 = vpop.permute.xlu1 %750 }
 0x23b   : > { %821 = vst.msk [vmem:[#allocation2 + $0xd0] sm:$0xff] %vm794_vm3, %v751_v19 }
 0x23d   : > { %v1329_v20 = vpop.permute.xlu0 %1328  ;;  %v2771_v2 = vpop.f32.mrb[4].mxu0  ;;  %v1816_v11 = vld [vmem:[#allocation2 + $0xb8] sm:$0xff] }
 0x23e   : > { %1400 = vst.msk [vmem:[#allocation2 + $0xc8] sm:$0xff] %vm1374_vm6, %v1329_v20  ;;  %v1520_v48 = vpop.permute.xlu1 %1519  ;;  %v2017_v49 = vpop.f32.mrb[5].mxu0  ;;  %2797 = vmatmul.mubr.msk.f32.gmra.mrb[6].mxu1 %vm1834_vm9, %v1816_v11  ;;  %v2264_v4 = vmul.f32 %v2771_v2, %v2771_v2  ;;  %v2197_v38 = vsel %vm214_vm0, %v2771_v2, 0.0 }
 0x23f   : > { %2161 = vst.msk [vmem:[%s3975_s25 + $0x28] sm:$0xff] %vm214_vm0, %v2771_v2  ;;  %2160 = vst.msk [vmem:[%s3975_s25 + $0x20] sm:$0xff] %vm214_vm0, %v2017_v49  ;;  %v2195_v28 = vsel %vm214_vm0, %v2017_v49, 0.0  ;;  %v2263_v58 = vmul.f32 %v2017_v49, %v2017_v49 }
 0x240   : > { %1592 = vst.msk [vmem:[#allocation2 + $0xc0] sm:$0xff] %vm1567_vm7, %v1520_v48  ;;  %v2196_v59 = vadd.f32 %v2195_v28, %v2194_v9  ;;  %v2300_v15 = vsel %vm214_vm0, %v2264_v4, 0.0 }
 0x241   : > { %v2298_v60 = vsel %vm214_vm0, %v2263_v58, 0.0  ;;  %v753_v14 = vpop.permute.xlu0 %752 }
 0x242   : > { %v2299_v31 = vadd.f32 %v2298_v60, %v2297_v46  ;;  %822 = vst.msk [vmem:[#allocation2 + $0xd8] sm:$0xff] %vm794_vm3, %v753_v14  ;;  %v944_v61 = vpop.permute.xlu1 %943  ;;  %v2198_v13 = vadd.f32 %v2197_v38, %v2196_v59 }
 0x243   : > { %1014 = vst.msk [vmem:[#allocation2 + $0xd0] sm:$0xff] %vm987_vm4, %v944_v61 }
 0x244   : > { %v2301_v39 = vadd.f32 %v2300_v15, %v2299_v31 }
 0x245   : > { %v1522_v50 = vpop.permute.xlu0 %1521 }
 0x246   : > { %1593 = vst.msk [vmem:[#allocation2 + $0xc8] sm:$0xff] %vm1567_vm7, %v1522_v50  ;;  %v1713_v51 = vpop.permute.xlu1 %1712 }
 0x247   : > { %1785 = vst.msk [vmem:[#allocation2 + $0xc0] sm:$0xff] %vm1760_vm8, %v1713_v51 }
 0x249   : > { %v946_v1 = vpop.permute.xlu0 %945 }
 0x24a   : > { %1015 = vst.msk [vmem:[#allocation2 + $0xd8] sm:$0xff] %vm987_vm4, %v946_v1  ;;  %v1137_v32 = vpop.permute.xlu1 %1136 }
 0x24b   : > { %1207 = vst.msk [vmem:[#allocation2 + $0xd0] sm:$0xff] %vm1180_vm5, %v1137_v32 }
 0x24d   : > { %v1715_v5 = vpop.permute.xlu0 %1714 }
 0x24e   : > { %1786 = vst.msk [vmem:[#allocation2 + $0xc8] sm:$0xff] %vm1760_vm8, %v1715_v5  ;;  %v1139_v29 = vpop.permute.xlu1 %1138  ;;  %v1817_v30 = vld [vmem:[#allocation2 + $0xc0] sm:$0xff] }
 0x24f   : > { %1208 = vst.msk [vmem:[#allocation2 + $0xd8] sm:$0xff] %vm1180_vm5, %v1139_v29  ;;  %2799 = vmatprep.mubr.msk.f32.mxu1 %vm1834_vm9, %v1817_v30 }
 0x251   : > { %v1331_v18 = vpop.permute.xlu0 %1330  ;;  %v2774_v33 = vpop.f32.mrb[6].mxu0 }
 0x252   : > { %1401 = vst.msk [vmem:[#allocation2 + $0xd0] sm:$0xff] %vm1374_vm6, %v1331_v18  ;;  %v755_v3 = vpop.permute.xlu1 %754  ;;  %v2027_v40 = vpop.f32.mrb[7].mxu0  ;;  %v2266_v22 = vmul.f32 %v2774_v33, %v2774_v33  ;;  %v2201_v6 = vsel %vm214_vm0, %v2774_v33, 0.0 }
 0x253   : > { %2163 = vst.msk [vmem:[%s3975_s25 + $0x38] sm:$0xff] %vm214_vm0, %v2774_v33  ;;  %2162 = vst.msk [vmem:[%s3975_s25 + $0x30] sm:$0xff] %vm214_vm0, %v2027_v40  ;;  %v2199_v21 = vsel %vm214_vm0, %v2027_v40, 0.0  ;;  %v2265_v52 = vmul.f32 %v2027_v40, %v2027_v40 }
 0x254   : > { %823 = vst.msk [vmem:[#allocation2 + $0xe0] sm:$0xff] %vm794_vm3, %v755_v3  ;;  %v2200_v23 = vadd.f32 %v2199_v21, %v2198_v13  ;;  %v2304_v7 = vsel %vm214_vm0, %v2266_v22, 0.0 }
 0x255   : > { %v2302_v53 = vsel %vm214_vm0, %v2265_v52, 0.0  ;;  %v1333_v41 = vpop.permute.xlu0 %1332  ;;  %v1818_v17 = vld [vmem:[#allocation2 + $0xc8] sm:$0xff] }
 0x256   : > { %v2303_v34 = vadd.f32 %v2302_v53, %v2301_v39  ;;  %1402 = vst.msk [vmem:[#allocation2 + $0xd8] sm:$0xff] %vm1374_vm6, %v1333_v41  ;;  %v1524_v62 = vpop.permute.xlu1 %1523  ;;  %2800 = vmatmul.mubr.msk.f32.gmra.mrb[8].mxu1 %vm1834_vm9, %v1818_v17  ;;  %v2202_v63 = vadd.f32 %v2201_v6, %v2200_v23 }
 0x257   : > { %1594 = vst.msk [vmem:[#allocation2 + $0xd0] sm:$0xff] %vm1567_vm7, %v1524_v62 }
 0x258   : > { %v2305_v42 = vadd.f32 %v2304_v7, %v2303_v34 }
 0x259   : > { %v757_v43 = vpop.permute.xlu0 %756 }
 0x25a   : > { %824 = vst.msk [vmem:[#allocation2 + $0xe8] sm:$0xff] %vm794_vm3, %v757_v43  ;;  %v948_v35 = vpop.permute.xlu1 %947 }
 0x25b   : > { %1016 = vst.msk [vmem:[#allocation2 + $0xe0] sm:$0xff] %vm987_vm4, %v948_v35 }
 0x25d   : > { %v1526_v12 = vpop.permute.xlu0 %1525 }
 0x25e   : > { %1595 = vst.msk [vmem:[#allocation2 + $0xd8] sm:$0xff] %vm1567_vm7, %v1526_v12  ;;  %v1717_v24 = vpop.permute.xlu1 %1716 }
 0x25f   : > { %1787 = vst.msk [vmem:[#allocation2 + $0xd0] sm:$0xff] %vm1760_vm8, %v1717_v24 }
 0x261   : > { %v950_v25 = vpop.permute.xlu0 %949 }
 0x262   : > { %1017 = vst.msk [vmem:[#allocation2 + $0xe8] sm:$0xff] %vm987_vm4, %v950_v25  ;;  %v1141_v44 = vpop.permute.xlu1 %1140 }
 0x263   : > { %1209 = vst.msk [vmem:[#allocation2 + $0xe0] sm:$0xff] %vm1180_vm5, %v1141_v44 }
 0x265   : > { %v1719_v8 = vpop.permute.xlu0 %1718 }
 0x266   : > { %1788 = vst.msk [vmem:[#allocation2 + $0xd8] sm:$0xff] %vm1760_vm8, %v1719_v8  ;;  %v1143_v54 = vpop.permute.xlu1 %1142  ;;  %v1819_v16 = vld [vmem:[#allocation2 + $0xd0] sm:$0xff] }
 0x267   : > { %1210 = vst.msk [vmem:[#allocation2 + $0xe8] sm:$0xff] %vm1180_vm5, %v1143_v54  ;;  %2802 = vmatprep.mubr.msk.f32.mxu1 %vm1834_vm9, %v1819_v16 }
 0x269   : > { %v1335_v45 = vpop.permute.xlu0 %1334  ;;  %v2777_v55 = vpop.f32.mrb[8].mxu0 }
 0x26a   : > { %1403 = vst.msk [vmem:[#allocation2 + $0xe0] sm:$0xff] %vm1374_vm6, %v1335_v45  ;;  %v759_v56 = vpop.permute.xlu1 %758  ;;  %v2037_v57 = vpop.f32.mrb[9].mxu0  ;;  %v2268_v9 = vmul.f32 %v2777_v55, %v2777_v55  ;;  %v2205_v0 = vsel %vm214_vm0, %v2777_v55, 0.0 }
 0x26b   : > { %2165 = vst.msk [vmem:[%s3975_s25 + $0x48] sm:$0xff] %vm214_vm0, %v2777_v55  ;;  %2164 = vst.msk [vmem:[%s3975_s25 + $0x40] sm:$0xff] %vm214_vm0, %v2037_v57  ;;  %v2203_v36 = vsel %vm214_vm0, %v2037_v57, 0.0  ;;  %v2267_v46 = vmul.f32 %v2037_v57, %v2037_v57 }
 0x26c   : > { %825 = vst.msk [vmem:[#allocation2 + $0xf0] sm:$0xff] %vm794_vm3, %v759_v56  ;;  %v2204_v47 = vadd.f32 %v2203_v36, %v2202_v63  ;;  %v2308_v2 = vsel %vm214_vm0, %v2268_v9, 0.0 }
 0x26d   : > { %v2306_v26 = vsel %vm214_vm0, %v2267_v46, 0.0  ;;  %v1337_v27 = vpop.permute.xlu0 %1336  ;;  %v1820_v37 = vld [vmem:[#allocation2 + $0xd8] sm:$0xff] }
 0x26e   : > { %v2307_v10 = vadd.f32 %v2306_v26, %v2305_v42  ;;  %1404 = vst.msk [vmem:[#allocation2 + $0xe8] sm:$0xff] %vm1374_vm6, %v1337_v27  ;;  %v1528_v19 = vpop.permute.xlu1 %1527  ;;  %2803 = vmatmul.mubr.msk.f32.gmra.mrb[10].mxu1 %vm1834_vm9, %v1820_v37  ;;  %v2206_v20 = vadd.f32 %v2205_v0, %v2204_v47 }
 0x26f   : > { %1596 = vst.msk [vmem:[#allocation2 + $0xe0] sm:$0xff] %vm1567_vm7, %v1528_v19 }
 0x270   : > { %v2309_v11 = vadd.f32 %v2308_v2, %v2307_v10 }
 0x271   : > { %v761_v48 = vpop.permute.xlu0 %760 }
 0x272   : > { %826 = vst.msk [vmem:[#allocation2 + $0xf8] sm:$0xff] %vm794_vm3, %v761_v48  ;;  %v952_v49 = vpop.permute.xlu1 %951 }
 0x273   : > { %1018 = vst.msk [vmem:[#allocation2 + $0xf0] sm:$0xff] %vm987_vm4, %v952_v49 }
 0x275   : > { %v1530_v4 = vpop.permute.xlu0 %1529 }
 0x276   : > { %1597 = vst.msk [vmem:[#allocation2 + $0xe8] sm:$0xff] %vm1567_vm7, %v1530_v4  ;;  %v1721_v28 = vpop.permute.xlu1 %1720 }
 0x277   : > { %1789 = vst.msk [vmem:[#allocation2 + $0xe0] sm:$0xff] %vm1760_vm8, %v1721_v28 }
 0x279   : > { %v954_v58 = vpop.permute.xlu0 %953 }
 0x27a   : > { %1019 = vst.msk [vmem:[#allocation2 + $0xf8] sm:$0xff] %vm987_vm4, %v954_v58  ;;  %v1145_v59 = vpop.permute.xlu1 %1144 }
 0x27b   : > { %1211 = vst.msk [vmem:[#allocation2 + $0xf0] sm:$0xff] %vm1180_vm5, %v1145_v59 }
 0x27d   : > { %v1723_v38 = vpop.permute.xlu0 %1722 }
 0x27e   : > { %1790 = vst.msk [vmem:[#allocation2 + $0xe8] sm:$0xff] %vm1760_vm8, %v1723_v38  ;;  %v1147_v60 = vpop.permute.xlu1 %1146  ;;  %v1821_v14 = vld [vmem:[#allocation2 + $0xe0] sm:$0xff] }
 0x27f   : > { %1212 = vst.msk [vmem:[#allocation2 + $0xf8] sm:$0xff] %vm1180_vm5, %v1147_v60  ;;  %2805 = vmatprep.mubr.msk.f32.mxu1 %vm1834_vm9, %v1821_v14 }
 0x281   : > { %v1339_v31 = vpop.permute.xlu0 %1338  ;;  %v2780_v61 = vpop.f32.mrb[10].mxu0 }
 0x282   : > { %1405 = vst.msk [vmem:[#allocation2 + $0xf0] sm:$0xff] %vm1374_vm6, %v1339_v31  ;;  %v1341_v13 = vpop.permute.xlu1 %1340  ;;  %v2047_v15 = vpop.f32.mrb[11].mxu0  ;;  %v2270_v39 = vmul.f32 %v2780_v61, %v2780_v61  ;;  %v2209_v32 = vsel %vm214_vm0, %v2780_v61, 0.0 }
 0x283   : > { %2167 = vst.msk [vmem:[%s3975_s25 + $0x58] sm:$0xff] %vm214_vm0, %v2780_v61  ;;  %2166 = vst.msk [vmem:[%s3975_s25 + $0x50] sm:$0xff] %vm214_vm0, %v2047_v15  ;;  %v2207_v50 = vsel %vm214_vm0, %v2047_v15, 0.0  ;;  %v2269_v51 = vmul.f32 %v2047_v15, %v2047_v15 }
 0x284   : > { %1406 = vst.msk [vmem:[#allocation2 + $0xf8] sm:$0xff] %vm1374_vm6, %v1341_v13  ;;  %v2208_v1 = vadd.f32 %v2207_v50, %v2206_v20  ;;  %v2312_v40 = vsel %vm214_vm0, %v2270_v39, 0.0 }
 0x285   : > { %v2310_v5 = vsel %vm214_vm0, %v2269_v51, 0.0  ;;  %v1532_v29 = vpop.permute.xlu0 %1531  ;;  %v1822_v30 = vld [vmem:[#allocation2 + $0xe8] sm:$0xff] }
 0x286   : > { %v2311_v18 = vadd.f32 %v2310_v5, %v2309_v11  ;;  %1598 = vst.msk [vmem:[#allocation2 + $0xf0] sm:$0xff] %vm1567_vm7, %v1532_v29  ;;  %v1534_v33 = vpop.permute.xlu1 %1533  ;;  %2806 = vmatmul.mubr.msk.f32.gmra.mrb[12].mxu1 %vm1834_vm9, %v1822_v30  ;;  %v2210_v3 = vadd.f32 %v2209_v32, %v2208_v1 }
 0x287   : > { %1599 = vst.msk [vmem:[#allocation2 + $0xf8] sm:$0xff] %vm1567_vm7, %v1534_v33 }
 0x288   : > { %v2313_v22 = vadd.f32 %v2312_v40, %v2311_v18 }
 0x289   : > { %v1725_v21 = vpop.permute.xlu0 %1724 }
 0x28a   : > { %1791 = vst.msk [vmem:[#allocation2 + $0xf0] sm:$0xff] %vm1760_vm8, %v1725_v21  ;;  %v1727_v52 = vpop.permute.xlu1 %1726 }
 0x28b   : > { %1792 = vst.msk [vmem:[#allocation2 + $0xf8] sm:$0xff] %vm1760_vm8, %v1727_v52 }
 0x291   : > { %v1823_v23 = vld [vmem:[#allocation2 + $0xf0] sm:$0xff] }
 0x292   : > { %2808 = vmatprep.mubr.msk.f32.mxu1 %vm1834_vm9, %v1823_v23  ;;  %v1824_v6 = vld [vmem:[#allocation2 + $0xf8] sm:$0xff] }
 0x293   : > { %2809 = vmatmul.mubr.msk.f32.gmra.mrb[14].mxu1 %vm1834_vm9, %v1824_v6 }
 0x299   : > { %v2783_v53 = vpop.f32.mrb[12].mxu0 }
 0x29a   : > { %2169 = vst.msk [vmem:[%s3975_s25 + $0x68] sm:$0xff] %vm214_vm0, %v2783_v53  ;;  %v2057_v41 = vpop.f32.mrb[13].mxu0  ;;  %v2272_v17 = vmul.f32 %v2783_v53, %v2783_v53  ;;  %v2213_v7 = vsel %vm214_vm0, %v2783_v53, 0.0 }
 0x29b   : > { %2168 = vst.msk [vmem:[%s3975_s25 + $0x60] sm:$0xff] %vm214_vm0, %v2057_v41  ;;  %v2211_v34 = vsel %vm214_vm0, %v2057_v41, 0.0  ;;  %v2271_v62 = vmul.f32 %v2057_v41, %v2057_v41 }
 0x29c   : > { %v2212_v63 = vadd.f32 %v2211_v34, %v2210_v3  ;;  %v2316_v12 = vsel %vm214_vm0, %v2272_v17, 0.0 }
 0x29d   : > { %v2314_v42 = vsel %vm214_vm0, %v2271_v62, 0.0 }
 0x29e   : > { %v2315_v43 = vadd.f32 %v2314_v42, %v2313_v22  ;;  %v2214_v35 = vadd.f32 %v2213_v7, %v2212_v63 }
 0x2a0   : > { %v2317_v24 = vadd.f32 %v2316_v12, %v2315_v43 }
 0x2b1   : > { %v2786_v25 = vpop.f32.mrb[14].mxu0 }
 0x2b2   : > { %2171 = vst.msk [vmem:[%s3975_s25 + $0x78] sm:$0xff] %vm214_vm0, %v2786_v25  ;;  %v2067_v44 = vpop.f32.mrb[15].mxu0  ;;  %v2274_v8 = vmul.f32 %v2786_v25, %v2786_v25  ;;  %v2217_v55 = vsel %vm214_vm0, %v2786_v25, 0.0 }
 0x2b3   : > { %2170 = vst.msk [vmem:[%s3975_s25 + $0x70] sm:$0xff] %vm214_vm0, %v2067_v44  ;;  %v2215_v54 = vsel %vm214_vm0, %v2067_v44, 0.0  ;;  %v2273_v16 = vmul.f32 %v2067_v44, %v2067_v44 }
 0x2b4   : > { %v2216_v45 = vadd.f32 %v2215_v54, %v2214_v35  ;;  %v2320_v36 = vsel %vm214_vm0, %v2274_v8, 0.0 }
 0x2b5   : > { %v2318_v56 = vsel %vm214_vm0, %v2273_v16, 0.0 }
 0x2b6   : > { %v2218_v57 = vadd.f32 %v2217_v55, %v2216_v45  ;;  %v2319_v9 = vadd.f32 %v2318_v56, %v2317_v24 }
 0x2b8   : > { %v2321_v46 = vadd.f32 %v2320_v36, %v2319_v9 }
 0x2c9   : > { %v2789_v47 = vpop.f32.mrb[0].mxu1 }
 0x2ca   : > { %2173 = vst.msk [vmem:[%s3975_s25 + $0x88] sm:$0xff] %vm214_vm0, %v2789_v47  ;;  %v2077_v0 = vpop.f32.mrb[1].mxu1  ;;  %v2276_v26 = vmul.f32 %v2789_v47, %v2789_v47  ;;  %v2221_v19 = vsel %vm214_vm0, %v2789_v47, 0.0 }
 0x2cb   : > { %2172 = vst.msk [vmem:[%s3975_s25 + $0x80] sm:$0xff] %vm214_vm0, %v2077_v0  ;;  %v2219_v27 = vsel %vm214_vm0, %v2077_v0, 0.0  ;;  %v2275_v37 = vmul.f32 %v2077_v0, %v2077_v0 }
 0x2cc   : > { %v2220_v10 = vadd.f32 %v2219_v27, %v2218_v57  ;;  %v2324_v48 = vsel %vm214_vm0, %v2276_v26, 0.0 }
 0x2cd   : > { %v2322_v20 = vsel %vm214_vm0, %v2275_v37, 0.0 }
 0x2ce   : > { %v2323_v2 = vadd.f32 %v2322_v20, %v2321_v46  ;;  %v2222_v11 = vadd.f32 %v2221_v19, %v2220_v10 }
 0x2d0   : > { %v2325_v49 = vadd.f32 %v2324_v48, %v2323_v2 }
 0x2e1   : > { %v2792_v4 = vpop.f32.mrb[2].mxu1 }
 0x2e2   : > { %2175 = vst.msk [vmem:[%s3975_s25 + $0x98] sm:$0xff] %vm214_vm0, %v2792_v4  ;;  %v2087_v28 = vpop.f32.mrb[3].mxu1  ;;  %v2278_v58 = vmul.f32 %v2792_v4, %v2792_v4  ;;  %v2225_v14 = vsel %vm214_vm0, %v2792_v4, 0.0 }
 0x2e3   : > { %2174 = vst.msk [vmem:[%s3975_s25 + $0x90] sm:$0xff] %vm214_vm0, %v2087_v28  ;;  %v2223_v59 = vsel %vm214_vm0, %v2087_v28, 0.0  ;;  %v2277_v38 = vmul.f32 %v2087_v28, %v2087_v28 }
 0x2e4   : > { %v2224_v60 = vadd.f32 %v2223_v59, %v2222_v11  ;;  %v2328_v15 = vsel %vm214_vm0, %v2278_v58, 0.0 }
 0x2e5   : > { %v2326_v31 = vsel %vm214_vm0, %v2277_v38, 0.0 }
 0x2e6   : > { %v2327_v61 = vadd.f32 %v2326_v31, %v2325_v49  ;;  %v2226_v13 = vadd.f32 %v2225_v14, %v2224_v60 }
 0x2e8   : > { %v2329_v39 = vadd.f32 %v2328_v15, %v2327_v61 }
 0x2f9   : > { %v2795_v50 = vpop.f32.mrb[4].mxu1 }
 0x2fa   : > { %2177 = vst.msk [vmem:[%s3975_s25 + $0xa8] sm:$0xff] %vm214_vm0, %v2795_v50  ;;  %v2097_v51 = vpop.f32.mrb[5].mxu1  ;;  %v2280_v1 = vmul.f32 %v2795_v50, %v2795_v50  ;;  %v2229_v30 = vsel %vm214_vm0, %v2795_v50, 0.0 }
 0x2fb   : > { %2176 = vst.msk [vmem:[%s3975_s25 + $0xa0] sm:$0xff] %vm214_vm0, %v2097_v51  ;;  %v2227_v32 = vsel %vm214_vm0, %v2097_v51, 0.0  ;;  %v2279_v5 = vmul.f32 %v2097_v51, %v2097_v51 }
 0x2fc   : > { %v2228_v29 = vadd.f32 %v2227_v32, %v2226_v13  ;;  %v2332_v40 = vsel %vm214_vm0, %v2280_v1, 0.0 }
 0x2fd   : > { %v2330_v18 = vsel %vm214_vm0, %v2279_v5, 0.0 }
 0x2fe   : > { %v2331_v33 = vadd.f32 %v2330_v18, %v2329_v39  ;;  %v2230_v3 = vadd.f32 %v2229_v30, %v2228_v29 }
 0x300   : > { %v2333_v22 = vadd.f32 %v2332_v40, %v2331_v33 }
 0x311   : > { %v2798_v21 = vpop.f32.mrb[6].mxu1 }
 0x312   : > { %2179 = vst.msk [vmem:[%s3975_s25 + $0xb8] sm:$0xff] %vm214_vm0, %v2798_v21  ;;  %v2107_v52 = vpop.f32.mrb[7].mxu1  ;;  %v2282_v23 = vmul.f32 %v2798_v21, %v2798_v21  ;;  %v2233_v17 = vsel %vm214_vm0, %v2798_v21, 0.0 }
 0x313   : > { %2178 = vst.msk [vmem:[%s3975_s25 + $0xb0] sm:$0xff] %vm214_vm0, %v2107_v52  ;;  %v2231_v6 = vsel %vm214_vm0, %v2107_v52, 0.0  ;;  %v2281_v53 = vmul.f32 %v2107_v52, %v2107_v52 }
 0x314   : > { %v2232_v41 = vadd.f32 %v2231_v6, %v2230_v3  ;;  %v2336_v7 = vsel %vm214_vm0, %v2282_v23, 0.0 }
 0x315   : > { %v2334_v34 = vsel %vm214_vm0, %v2281_v53, 0.0 }
 0x316   : > { %v2335_v62 = vadd.f32 %v2334_v34, %v2333_v22  ;;  %v2234_v63 = vadd.f32 %v2233_v17, %v2232_v41 }
 0x318   : > { %v2337_v42 = vadd.f32 %v2336_v7, %v2335_v62 }
 0x329   : > { %v2801_v43 = vpop.f32.mrb[8].mxu1 }
 0x32a   : > { %2181 = vst.msk [vmem:[%s3975_s25 + $0xc8] sm:$0xff] %vm214_vm0, %v2801_v43  ;;  %v2117_v35 = vpop.f32.mrb[9].mxu1  ;;  %v2284_v12 = vmul.f32 %v2801_v43, %v2801_v43  ;;  %v2237_v8 = vsel %vm214_vm0, %v2801_v43, 0.0 }
 0x32b   : > { %2180 = vst.msk [vmem:[%s3975_s25 + $0xc0] sm:$0xff] %vm214_vm0, %v2117_v35  ;;  %v2235_v24 = vsel %vm214_vm0, %v2117_v35, 0.0  ;;  %v2283_v25 = vmul.f32 %v2117_v35, %v2117_v35 }
 0x32c   : > { %v2236_v44 = vadd.f32 %v2235_v24, %v2234_v63  ;;  %v2340_v55 = vsel %vm214_vm0, %v2284_v12, 0.0 }
 0x32d   : > { %v2338_v54 = vsel %vm214_vm0, %v2283_v25, 0.0 }
 0x32e   : > { %v2339_v16 = vadd.f32 %v2338_v54, %v2337_v42  ;;  %v2238_v45 = vadd.f32 %v2237_v8, %v2236_v44 }
 0x330   : > { %v2341_v56 = vadd.f32 %v2340_v55, %v2339_v16 }
 0x341   : > { %v2804_v57 = vpop.f32.mrb[10].mxu1 }
 0x342   : > { %2183 = vst.msk [vmem:[%s3975_s25 + $0xd8] sm:$0xff] %vm214_vm0, %v2804_v57  ;;  %v2127_v9 = vpop.f32.mrb[11].mxu1  ;;  %v2286_v36 = vmul.f32 %v2804_v57, %v2804_v57  ;;  %v2241_v26 = vsel %vm214_vm0, %v2804_v57, 0.0 }
 0x343   : > { %2182 = vst.msk [vmem:[%s3975_s25 + $0xd0] sm:$0xff] %vm214_vm0, %v2127_v9  ;;  %v2239_v46 = vsel %vm214_vm0, %v2127_v9, 0.0  ;;  %v2285_v47 = vmul.f32 %v2127_v9, %v2127_v9 }
 0x344   : > { %v2240_v0 = vadd.f32 %v2239_v46, %v2238_v45  ;;  %v2344_v19 = vsel %vm214_vm0, %v2286_v36, 0.0 }
 0x345   : > { %v2342_v27 = vsel %vm214_vm0, %v2285_v47, 0.0 }
 0x346   : > { %v2343_v37 = vadd.f32 %v2342_v27, %v2341_v56  ;;  %v2242_v10 = vadd.f32 %v2241_v26, %v2240_v0 }
 0x348   : > { %v2345_v20 = vadd.f32 %v2344_v19, %v2343_v37 }
 0x359   : > { %v2807_v2 = vpop.f32.mrb[12].mxu1 }
 0x35a   : > { %2185 = vst.msk [vmem:[%s3975_s25 + $0xe8] sm:$0xff] %vm214_vm0, %v2807_v2  ;;  %v2137_v11 = vpop.f32.mrb[13].mxu1  ;;  %v2288_v48 = vmul.f32 %v2807_v2, %v2807_v2  ;;  %v2245_v58 = vsel %vm214_vm0, %v2807_v2, 0.0 }
 0x35b   : > { %2184 = vst.msk [vmem:[%s3975_s25 + $0xe0] sm:$0xff] %vm214_vm0, %v2137_v11  ;;  %v2243_v49 = vsel %vm214_vm0, %v2137_v11, 0.0  ;;  %v2287_v4 = vmul.f32 %v2137_v11, %v2137_v11 }
 0x35c   : > { %v2244_v28 = vadd.f32 %v2243_v49, %v2242_v10  ;;  %v2348_v14 = vsel %vm214_vm0, %v2288_v48, 0.0 }
 0x35d   : > { %v2346_v59 = vsel %vm214_vm0, %v2287_v4, 0.0 }
 0x35e   : > { %v2347_v38 = vadd.f32 %v2346_v59, %v2345_v20  ;;  %v2246_v60 = vadd.f32 %v2245_v58, %v2244_v28 }
 0x360   : > { %v2349_v31 = vadd.f32 %v2348_v14, %v2347_v38 }
 0x366   : > { %v2810_v61 = vpop.f32.mrb[14].mxu1 }
 0x367   : > { %2187 = vst.msk [vmem:[%s3975_s25 + $0xf8] sm:$0xff] %vm214_vm0, %v2810_v61  ;;  %v2147_v13 = vpop.f32.mrb[15].mxu1  ;;  %v2290_v15 = vmul.f32 %v2810_v61, %v2810_v61  ;;  %v2249_v1 = vsel %vm214_vm0, %v2810_v61, 0.0 }
 0x368   : > { %2186 = vst.msk [vmem:[%s3975_s25 + $0xf0] sm:$0xff] %vm214_vm0, %v2147_v13  ;;  %v2247_v39 = vsel %vm214_vm0, %v2147_v13, 0.0  ;;  %v2289_v50 = vmul.f32 %v2147_v13, %v2147_v13 }
 0x369   : > { %v2248_v51 = vadd.f32 %v2247_v39, %v2246_v60  ;;  %v2352_v30 = vsel %vm214_vm0, %v2290_v15, 0.0 }
 0x36a   : > { %v2350_v32 = vsel %vm214_vm0, %v2289_v50, 0.0 }
 0x36b   : > { %v2250_v5 = vadd.f32 %v2249_v1, %v2248_v51  ;;  %v2351_v29 = vadd.f32 %v2350_v32, %v2349_v31 }
 0x36d   : > { %v2251_v18 = vrot.slane %v2250_v5, 4  ;;  %v2353_v33 = vadd.f32 %v2352_v30, %v2351_v29 }
 0x36f   : > { %v2252_v3 = vadd.f32 %v2251_v18, %v2250_v5  ;;  %v2354_v40 = vrot.slane %v2353_v33, 4 }
 0x371   : > { %v2253_v22 = vrot.slane %v2252_v3, 2  ;;  %v2355_v21 = vadd.f32 %v2354_v40, %v2353_v33 }
 0x373   : > { %v2254_v52 = vadd.f32 %v2253_v22, %v2252_v3  ;;  %v2356_v23 = vrot.slane %v2355_v21, 2 }
 0x375   : > { %v2255_v6 = vrot.slane %v2254_v52, 1  ;;  %v2357_v53 = vadd.f32 %v2356_v23, %v2355_v21 }
 0x377   : > { %v2256_v41 = vadd.f32 %v2255_v6, %v2254_v52  ;;  %v2358_v17 = vrot.slane %v2357_v53, 1 }
 0x379   : > { %2258 = vst.msk [vmem:[%s171_s27] sm:$0x1] %vm2257_vm10, %v2256_v41  ;;  %v2359_v34 = vadd.f32 %v2358_v17, %v2357_v53 }
 0x37b   : > { %2360 = vst.msk [vmem:[%s171_s27 + $0x1] sm:$0x1] %vm2257_vm10, %v2359_v34 }
 0x37c   : > { %2898 = shalt.err (!%p2895_p3)
}
 0x37d   : > { %s2899_s17 = scalar_lea.hbm %s4186_s6, 32  ;;  %s2903_s9 = scalar_lea.hbm %s4231_s3, 64 }
 0x37e   : > { %p2900_p4 = scmp.ne.s32.totalorder %s4186_s6, %s2899_s17  ;;  %p2904_p9 = scmp.lt.u32.totalorder %s4186_s6, %s4231_s3 }
 0x37f   : > { %p2905_p10 = scmp.lt.u32.totalorder %s2903_s9, %s2899_s17  ;;  %p2907_p12 = scmp.lt.u32.totalorder %s2899_s17, %s4186_s6 }
 0x380   : > { %p2901_p7 = pnand %p2900_p4, %p3016_p5 }
 0x381   : > { %p2906_p11 = por %p2905_p10, %p2904_p9 }
 0x382   : > { %p2902_p8 = pneg %p2901_p7 }
 0x383   : > { %p2908_p13 = por %p2907_p12, %p2906_p11 }
 0x385   : > { %p2909_p0 = pnand %p2908_p13, %p2902_p8 }
 0x387   : > { %2912 = shalt.err (!%p2909_p0)
}
 0x388   : > { %2838 = dma.vmem_to_hbm [thread:$0]  (%p3016_p5), %s4188_s29, 32, %s4186_s6, %s2367_s7  }
 0x389 PF: > { %p2844_p1 = scmp.ge.s32.totalorder %s2947_s15, 2  ;;  %s2403_s24 = sand.u32 1, %s2935_s12  }
 0x38a   : > { %s2404_s28 = scalar_lea.sflag [#allocation4], %s2403_s24 }
 0x38b   : > { %p2841_p2 = pnand %p2844_p1, %p3020_p6 }
 0x38d   : > { %2930 = dma.done.wait (!%p2841_p2), %s2404_s28, 32  }
 0x38e   : > { %2932 = vsyncadd (!%p2841_p2), %s2404_s28, 4294967264  ;;  %p14_p3 = scmp.ge.s32.totalorder %s3003_s18, 4   ;;  %s4234_s12 = smov %s2939_s13 }
 0x38f   : > { %s4235_s13 = smov %s2943_s14  ;;  %s4236_s14 = smov %s3014_s21 }
 0x390   : > { %s4237_s15 = smov %s3003_s18  ;;  %16 = sbr.rel (!%p14_p3) target bundleno = 3 (0x3), region = 77 }
 0x397   :  { %2409 = vsyncpa [#allocation4], 1 }
 0x398   :  { %2411 = vsyncpa [#allocation4 + $0x1], 1 }

</bundles_post_ra>
